<compile_context>
chip_gen: v7x
topology: tpu7x:2x2x1
jax: 0.10.0
libtpu: 0.0.40
codegen_flags: <defaults>
</compile_context>

<pallas_src>
import jax
import jax.numpy as jnp
from jax.experimental import pallas as pl
from jax.experimental.pallas import tpu as pltpu


def _round_up(x, m):
    return ((x + m - 1) // m) * m


def generator_mlp_kernel(x_ref, w1_ref, b1_ref, w2_ref, b2_ref, o_ref):
    """Fused MLP tile: matmul (bf16 in / f32 acc) + bias + ReLU + matmul + bias + sigmoid."""
    x = x_ref[...].astype(w1_ref.dtype)                               # (tb, Din) f32 -> bf16 in-kernel
    h = jnp.dot(x, w1_ref[...], preferred_element_type=jnp.float32)   # (tb, H_p) f32 on MXU
    h = jnp.maximum(h + b1_ref[...], 0.0)                             # bias + ReLU in f32
    h = h.astype(w2_ref.dtype)                                        # bf16 for second MXU pass
    z = jnp.dot(h, w2_ref[...], preferred_element_type=jnp.float32)   # (tb, Dout) f32
    z = z + b2_ref[...]
    o_ref[...] = jax.nn.sigmoid(z).astype(o_ref.dtype)                # unpadded f32 store


def prepare_generator_params(w1, b1, w2, b2, *, compute_dtype=jnp.bfloat16):
    """One-time parameter prep (hoisted out of the per-call path).

    Weights are cast to bf16; only the hidden dim is zero-padded to a 128-lane
    multiple so the intermediate activation / second contraction are lane-dense.
    x and the output stay unpadded.  Weights use (in, out) layout (== PyTorch W.T).
    """
    Din, H = w1.shape
    Dout = w2.shape[1]
    H_p = max(128, _round_up(H, 128))
    w1_p = jnp.zeros((Din, H_p), compute_dtype).at[:, :H].set(w1.astype(compute_dtype))
    b1_p = jnp.zeros((1, H_p), jnp.float32).at[0, :H].set(b1.astype(jnp.float32))
    w2_p = jnp.zeros((H_p, Dout), compute_dtype).at[:H, :].set(w2.astype(compute_dtype))
    b2_p = b2.astype(jnp.float32).reshape(1, Dout)
    return w1_p, b1_p, w2_p, b2_p


def generator_forward(x, w1_p, b1_p, w2_p, b2_p, *, block_batch=1024,
                      small_batch_threshold=2048):
    """x: (B, Din) f32; pre-prepared params from prepare_generator_params; returns (B, Dout) f32."""
    B, Din = x.shape
    Din_w, H_p = w1_p.shape
    Dout = w2_p.shape[1]
    assert Din == Din_w, (Din, Din_w)

    # ---- tile / grid selection ----------------------------------------------
    if B <= small_batch_threshold:
        tb = max(8, _round_up(B, 8))                     # whole batch in one grid step
    else:
        tb = max(8, _round_up(min(block_batch, B), 8))   # large-batch tiling (>= 512 rows)
    B_p = _round_up(B, tb)
    grid = (B_p // tb,)

    # Pad batch rows only if needed (zeros are inert; sliced off below).
    x_in = x if B_p == B else jnp.zeros((B_p, Din), x.dtype).at[:B, :].set(x)

    # ---- VMEM budget (double-buffered tiles + weights + f32 intermediates) ---
    w_itemsize = jnp.dtype(w1_p.dtype).itemsize
    x_itemsize = jnp.dtype(x.dtype).itemsize
    vmem_needed = (
        2 * tb * Din * x_itemsize                     # x tile, double-buffered
        + 2 * tb * Dout * 4                           # out tile (f32), double-buffered
        + 2 * (w1_p.size + w2_p.size) * w_itemsize    # weights (double-buffered by default)
        + 4 * 8 * max(128, H_p) * 4                   # biases, sublane/lane padded in VMEM
        + 3 * tb * H_p * 4                            # f32 intermediates headroom
    )
    # Floor 8 MiB, ceiling 48 MiB (leave headroom under v7x's 64 MiB physical VMEM).
    vmem_limit = int(min(max(2 * vmem_needed, 8 << 20), 48 << 20))

    # Megacore sharding only pays off with >= 2 grid steps.
    semantics = ("parallel",) if grid[0] > 1 else ("arbitrary",)

    # ---- cost hint for the XLA scheduler -------------------------------------
    cost = pl.CostEstimate(
        flops=2 * B_p * (Din * H_p + H_p * Dout),
        transcendentals=2 * B_p * Dout,               # sigmoid ~ exp + reciprocal
        bytes_accessed=(B_p * Din * x_itemsize
                        + (w1_p.size + w2_p.size) * w_itemsize
                        + (b1_p.size + b2_p.size) * 4
                        + B_p * Dout * 4),
    )

    out = pl.pallas_call(
        generator_mlp_kernel,
        out_shape=jax.ShapeDtypeStruct((B_p, Dout), jnp.float32),
        grid_spec=pltpu.PrefetchScalarGridSpec(
            num_scalar_prefetch=0,
            grid=grid,
            in_specs=[
                pl.BlockSpec((tb, Din), lambda i: (i, 0)),      # x: streamed, unpadded
                pl.BlockSpec((Din, H_p), lambda i: (0, 0)),     # W1: VMEM-resident
                pl.BlockSpec((1, H_p), lambda i: (0, 0)),       # b1: resident
                pl.BlockSpec((H_p, Dout), lambda i: (0, 0)),    # W2: resident
                pl.BlockSpec((1, Dout), lambda i: (0, 0)),      # b2: resident
            ],
            out_specs=pl.BlockSpec((tb, Dout), lambda i: (i, 0)),
        ),
        compiler_params=pltpu.CompilerParams(
            dimension_semantics=semantics,
            vmem_limit_bytes=vmem_limit,
        ),
        cost_estimate=cost,
    )(x_in, w1_p, b1_p, w2_p, b2_p)

    return out if B_p == B else out[:B, :]


def init_generator_params(key, input_dim, hidden_dim, output_dim):
    """Deterministic synthetic params (PyTorch-Linear-like uniform init), (in, out) layout."""
    k1, k2, k3, k4 = jax.random.split(key, 4)
    lim1 = 1.0 / jnp.sqrt(input_dim)
    lim2 = 1.0 / jnp.sqrt(hidden_dim)
    w1 = jax.random.uniform(k1, (input_dim, hidden_dim), jnp.float32, -lim1, lim1)
    b1 = jax.random.uniform(k2, (hidden_dim,), jnp.float32, -lim1, lim1)
    w2 = jax.random.uniform(k3, (hidden_dim, output_dim), jnp.float32, -lim2, lim2)
    b2 = jax.random.uniform(k4, (output_dim,), jnp.float32, -lim2, lim2)
    return w1, b1, w2, b2


if __name__ == "__main__":
    # Small model dims (as in the module).  batch=512 exercises the
    # small-batch fast path (single grid step, no batch padding/slicing).
    input_dim, hidden_dim, output_dim = 16, 32, 16
    batch = 512

    key = jax.random.PRNGKey(0)
    kx, kp = jax.random.split(key)
    x = jax.random.normal(kx, (batch, input_dim), dtype=jnp.float32)
    w1, b1, w2, b2 = init_generator_params(kp, input_dim, hidden_dim, output_dim)

    # One-time param prep (hoisted out of the per-call path).
    params = prepare_generator_params(w1, b1, w2, b2)

    fwd = jax.jit(generator_forward)
    out = jax.block_until_ready(fwd(x, *params))

    # Pure-JAX f32 reference of the same math (bf16 matmul operands => ~1e-2 tol).
    ref = jax.nn.sigmoid(jnp.maximum(x @ w1 + b1, 0.0) @ w2 + b2)
    assert out.shape == (batch, output_dim)
    assert out.dtype == jnp.float32
    max_err = float(jnp.max(jnp.abs(out - ref)))
    assert max_err < 2e-2, max_err

    print("KERNEL_OK")
</pallas_src>

<mosaic_0001>
module attributes {stable_mosaic.version = 11 : i64} {
  func.func @generator_mlp_kernel(%arg0: i32, %arg1: memref<512x16xf32, #tpu.memory_space<vmem>>, %arg2: memref<16x128xbf16, #tpu.memory_space<vmem>>, %arg3: memref<1x128xf32, #tpu.memory_space<vmem>>, %arg4: memref<128x16xbf16, #tpu.memory_space<vmem>>, %arg5: memref<1x16xf32, #tpu.memory_space<vmem>>, %arg6: memref<512x16xf32, #tpu.memory_space<vmem>>) attributes {dimension_semantics = [#tpu.dimension_semantics<arbitrary>], iteration_bounds = array<i64: 1>, scalar_prefetch = 0 : i64, scratch_operands = 0 : i64, tpu.core_type = #tpu.core_type<tc>, window_params = [{transform_indices = @transform_0, window_bounds = array<i64: 512, 16>}, {pipeline_mode = #tpu.pipeline_mode<synchronous>, transform_indices = @transform_1, window_bounds = array<i64: 16, 128>}, {pipeline_mode = #tpu.pipeline_mode<synchronous>, transform_indices = @transform_2, window_bounds = array<i64: 1, 128>}, {pipeline_mode = #tpu.pipeline_mode<synchronous>, transform_indices = @transform_3, window_bounds = array<i64: 128, 16>}, {pipeline_mode = #tpu.pipeline_mode<synchronous>, transform_indices = @transform_4, window_bounds = array<i64: 1, 16>}, {transform_indices = @transform_5, window_bounds = array<i64: 512, 16>}]} {
    %c0 = arith.constant 0 : index
    %c0_0 = arith.constant 0 : index
    %0 = vector.load %arg1[%c0, %c0_0] : memref<512x16xf32, #tpu.memory_space<vmem>>, vector<512x16xf32>
    %1 = arith.truncf %0 : vector<512x16xf32> to vector<512x16xbf16>
    %c0_1 = arith.constant 0 : index
    %c0_2 = arith.constant 0 : index
    %2 = vector.load %arg2[%c0_1, %c0_2] : memref<16x128xbf16, #tpu.memory_space<vmem>>, vector<16x128xbf16>
    %cst = arith.constant dense<0.000000e+00> : vector<512x128xf32>
    %3 = tpu.matmul %1, %2, %cst {dimension_numbers = #tpu.dot_dimension_numbers<[1], [0], [0], [1], [0, 0, 1, 1], [], []>} : vector<512x16xbf16>, vector<16x128xbf16>, vector<512x128xf32> -> vector<512x128xf32>
    %c0_3 = arith.constant 0 : index
    %c0_4 = arith.constant 0 : index
    %4 = vector.load %arg3[%c0_3, %c0_4] : memref<1x128xf32, #tpu.memory_space<vmem>>, vector<1x128xf32>
    %5 = vector.broadcast %4 : vector<1x128xf32> to vector<512x128xf32>
    %6 = arith.addf %3, %5 : vector<512x128xf32>
    %cst_5 = arith.constant 0.000000e+00 : f32
    %7 = vector.broadcast %cst_5 : f32 to vector<512x128xf32>
    %8 = arith.maximumf %6, %7 : vector<512x128xf32>
    %9 = arith.truncf %8 : vector<512x128xf32> to vector<512x128xbf16>
    %c0_6 = arith.constant 0 : index
    %c0_7 = arith.constant 0 : index
    %10 = vector.load %arg4[%c0_6, %c0_7] : memref<128x16xbf16, #tpu.memory_space<vmem>>, vector<128x16xbf16>
    %cst_8 = arith.constant dense<0.000000e+00> : vector<512x16xf32>
    %11 = tpu.matmul %9, %10, %cst_8 {dimension_numbers = #tpu.dot_dimension_numbers<[1], [0], [0], [1], [0, 0, 1, 1], [], []>} : vector<512x128xbf16>, vector<128x16xbf16>, vector<512x16xf32> -> vector<512x16xf32>
    %c0_9 = arith.constant 0 : index
    %c0_10 = arith.constant 0 : index
    %12 = vector.load %arg5[%c0_9, %c0_10] : memref<1x16xf32, #tpu.memory_space<vmem>>, vector<1x16xf32>
    %13 = vector.broadcast %12 : vector<1x16xf32> to vector<512x16xf32>
    %14 = arith.addf %11, %13 : vector<512x16xf32>
    %15 = arith.negf %14 : vector<512x16xf32>
    %16 = math.exp %15 : vector<512x16xf32>
    %cst_11 = arith.constant 1.000000e+00 : f32
    %17 = vector.broadcast %cst_11 : f32 to vector<512x16xf32>
    %18 = arith.addf %17, %16 : vector<512x16xf32>
    %19 = arith.divf %17, %18 : vector<512x16xf32>
    %c0_12 = arith.constant 0 : index
    %c0_13 = arith.constant 0 : index
    %20 = vector.load %arg6[%c0_12, %c0_13] : memref<512x16xf32, #tpu.memory_space<vmem>>, vector<512x16xf32>
    tpu.vector_store %arg6[%c0_12, %c0_13], %19 {strides = array<i32>} : memref<512x16xf32, #tpu.memory_space<vmem>>, vector<512x16xf32>,
    return
  }
  func.func @transform_0(%arg0: i32) -> (i32, i32) {
    %c0_i32 = arith.constant 0 : i32
    %c0_i32_0 = arith.constant 0 : i32
    return %arg0, %c0_i32 : i32, i32
  }
  func.func @transform_1(%arg0: i32) -> (i32, i32) {
    %c0_i32 = arith.constant 0 : i32
    %c0_i32_0 = arith.constant 0 : i32
    %c0_i32_1 = arith.constant 0 : i32
    return %c0_i32, %c0_i32_0 : i32, i32
  }
  func.func @transform_2(%arg0: i32) -> (i32, i32) {
    %c0_i32 = arith.constant 0 : i32
    %c0_i32_0 = arith.constant 0 : i32
    %c0_i32_1 = arith.constant 0 : i32
    return %c0_i32, %c0_i32_0 : i32, i32
  }
  func.func @transform_3(%arg0: i32) -> (i32, i32) {
    %c0_i32 = arith.constant 0 : i32
    %c0_i32_0 = arith.constant 0 : i32
    %c0_i32_1 = arith.constant 0 : i32
    return %c0_i32, %c0_i32_0 : i32, i32
  }
  func.func @transform_4(%arg0: i32) -> (i32, i32) {
    %c0_i32 = arith.constant 0 : i32
    %c0_i32_0 = arith.constant 0 : i32
    %c0_i32_1 = arith.constant 0 : i32
    return %c0_i32, %c0_i32_0 : i32, i32
  }
  func.func @transform_5(%arg0: i32) -> (i32, i32) {
    %c0_i32 = arith.constant 0 : i32
    %c0_i32_0 = arith.constant 0 : i32
    return %arg0, %c0_i32 : i32, i32
  }
}

</mosaic_0001>

<bundles_post_ra>
// kernel: generator_forward.1
= control target key start
LH: loop header
LB: loop body
LE: loop exit
PB: predicated region body
PF: predicated region fallthrough
CT: control target
= control target key end

     0   :  { %vm132_vm0 = vcmask 130048   ;;  %s2711_s1 = inlined_call_operand.vmem [shape: bf16[16,128], index: 1, kind: input, shape index: {}]   ;;  %s2712_s0 = inlined_call_operand.vmem [shape: f32[512,16], index: 0, kind: input, shape index: {}]   ;;  %s2713_s3 = inlined_call_operand.vmem [shape: bf16[128,16], index: 3, kind: input, shape index: {}]   ;;  %s2714_s2 = inlined_call_operand.vmem [shape: f32[1,128], index: 2, kind: input, shape index: {}]   ;;  %s2715_s4 = inlined_call_operand.vmem [shape: f32[1,16], index: 4, kind: input, shape index: {}]   ;;  %s2716_s5 = inlined_call_operand.vmem [shape: f32[512,16], index: 5, kind: output, shape index: {}]  }
   0x1   :  { %v1768_v0 = vld [vmem:[%s2711_s1] sm:$0xff]   ;;  %v22_v2 = vld [vmem:[%s2712_s0 + $0x8] sm:$0xff]  ;;  %v23_v3 = vld [vmem:[%s2712_s0 + $0x10] sm:$0xff] }
   0x2   :  { %v21_v1 = vld [vmem:[%s2712_s0] sm:$0xff]  ;;  %1606 = vmatprep.subr.bf16.mxu0 %v1768_v0  ;;  %v24_v5 = vld [vmem:[%s2712_s0 + $0x18] sm:$0xff]  ;;  %v26_v7 = vld [vmem:[%s2712_s0 + $0x28] sm:$0xff] }
   0x3   :  { %v85_v4 = vpack.c.bf16 %v22_v2, %v21_v1  ;;  %v25_v6 = vld [vmem:[%s2712_s0 + $0x20] sm:$0xff]  ;;  %1607 = vmatpush3.bf16.msra.mxu0 %v1768_v0  ;;  %v86_v8 = vpack.c.bf16 %v24_v5, %v23_v3  ;;  %v27_v10 = vld [vmem:[%s2712_s0 + $0x30] sm:$0xff]  ;;  %v28_v11 = vld [vmem:[%s2712_s0 + $0x38] sm:$0xff] }
   0x4   :  { %v87_v9 = vpack.c.bf16 %v26_v7, %v25_v6  ;;  %v29_v12 = vld [vmem:[%s2712_s0 + $0x40] sm:$0xff]  ;;  %v30_v13 = vld [vmem:[%s2712_s0 + $0x48] sm:$0xff]  ;;  %v88_v14 = vpack.c.bf16 %v28_v11, %v27_v10  ;;  %v31_v16 = vld [vmem:[%s2712_s0 + $0x50] sm:$0xff] }
   0x5   :  { %1608 = vmatprep.mubr.msk.bf16.mxu0 %vm132_vm0, %v85_v4  ;;  %v89_v15 = vpack.c.bf16 %v30_v13, %v29_v12  ;;  %v32_v17 = vld [vmem:[%s2712_s0 + $0x58] sm:$0xff]  ;;  %v33_v18 = vld [vmem:[%s2712_s0 + $0x60] sm:$0xff]  ;;  %v34_v19 = vld [vmem:[%s2712_s0 + $0x68] sm:$0xff] }
   0x6   :  { %1609 = vmatmul.mubr.msk.bf16.vlgmr.msra.gmra.mrb[0].mxu0 %vm132_vm0, %v86_v8  ;;  %v90_v20 = vpack.c.bf16 %v32_v17, %v31_v16  ;;  %v91_v21 = vpack.c.bf16 %v34_v19, %v33_v18  ;;  %v35_v22 = vld [vmem:[%s2712_s0 + $0x70] sm:$0xff]  ;;  %v36_v23 = vld [vmem:[%s2712_s0 + $0x78] sm:$0xff]  ;;  %v37_v24 = vld [vmem:[%s2712_s0 + $0x80] sm:$0xff] }
   0x7   :  { %1612 = vmatprep.mubr.msk.bf16.mxu0 %vm132_vm0, %v87_v9  ;;  %v38_v25 = vld [vmem:[%s2712_s0 + $0x88] sm:$0xff]  ;;  %v1769_v26 = vld [vmem:[%s2713_s3] sm:$0xff]   ;;  %v92_v28 = vpack.c.bf16 %v36_v23, %v35_v22  ;;  %v1771_v30 = vld [vmem:[%s2713_s3 + $0x10] sm:$0xff]  }
   0x8   :  { %v1770_v27 = vld [vmem:[%s2713_s3 + $0x8] sm:$0xff]   ;;  %1672 = vmatprep.subr.bf16.mxu0 %v1769_v26  ;;  %1752 = vmatprep.subr.bf16.mxu1 %v1769_v26  ;;  %v93_v29 = vpack.c.bf16 %v38_v25, %v37_v24  ;;  %v39_v31 = vld [vmem:[%s2712_s0 + $0x90] sm:$0xff]  ;;  %v40_v32 = vld [vmem:[%s2712_s0 + $0x98] sm:$0xff] }
   0x9   :  { %1673 = vmatpush3.bf16.msra.mxu0 %v1769_v26  ;;  %1760 = vmatpush3.bf16.msra.mxu1 %v1769_v26  ;;  %v41_v33 = vld [vmem:[%s2712_s0 + $0xa0] sm:$0xff]  ;;  %v42_v34 = vld [vmem:[%s2712_s0 + $0xa8] sm:$0xff]  ;;  %v1772_v35 = vld [vmem:[%s2713_s3 + $0x18] sm:$0xff]   ;;  %v94_v36 = vpack.c.bf16 %v40_v32, %v39_v31 }
   0xa   :  { %1674 = vmatprep.subr.bf16.mxu0 %v1770_v27  ;;  %1753 = vmatprep.subr.bf16.mxu1 %v1770_v27  ;;  %v95_v37 = vpack.c.bf16 %v42_v34, %v41_v33  ;;  %v1773_v38 = vld [vmem:[%s2713_s3 + $0x20] sm:$0xff]   ;;  %v43_v39 = vld [vmem:[%s2712_s0 + $0xb0] sm:$0xff]  ;;  %v44_v40 = vld [vmem:[%s2712_s0 + $0xb8] sm:$0xff] }
   0xb   :  { %v45_v41 = vld [vmem:[%s2712_s0 + $0xc0] sm:$0xff]  ;;  %v46_v42 = vld [vmem:[%s2712_s0 + $0xc8] sm:$0xff]  ;;  %v96_v44 = vpack.c.bf16 %v44_v40, %v43_v39  ;;  %v47_v46 = vld [vmem:[%s2712_s0 + $0xd0] sm:$0xff] }
   0xc   :  { %v1774_v43 = vld [vmem:[%s2713_s3 + $0x28] sm:$0xff]   ;;  %v97_v45 = vpack.c.bf16 %v46_v42, %v45_v41  ;;  %v48_v47 = vld [vmem:[%s2712_s0 + $0xd8] sm:$0xff]  ;;  %v49_v48 = vld [vmem:[%s2712_s0 + $0xe0] sm:$0xff] }
   0xd   :  { %1761 = vmatpush3.bf16.msra.mxu1 %v1770_v27  ;;  %1675 = vmatpush3.bf16.msra.mxu0 %v1770_v27  ;;  %v50_v49 = vld [vmem:[%s2712_s0 + $0xe8] sm:$0xff]  ;;  %v98_v50 = vpack.c.bf16 %v48_v47, %v47_v46  ;;  %v51_v52 = vld [vmem:[%s2712_s0 + $0xf0] sm:$0xff]  ;;  %v52_v53 = vld [vmem:[%s2712_s0 + $0xf8] sm:$0xff] }
   0xe   :  { %1613 = vmatmul.mubr.msk.bf16.gmra.mrb[4].mxu0 %vm132_vm0, %v88_v14  ;;  %1676 = vmatprep.subr.bf16.mxu0 %v1771_v30  ;;  %v99_v51 = vpack.c.bf16 %v50_v49, %v49_v48  ;;  %v53_v54 = vld [vmem:[%s2712_s0 + $0x100] sm:$0xff]  ;;  %v54_v55 = vld [vmem:[%s2712_s0 + $0x108] sm:$0xff]  ;;  %v100_v56 = vpack.c.bf16 %v52_v53, %v51_v52  ;;  %v55_v58 = vld [vmem:[%s2712_s0 + $0x110] sm:$0xff] }
   0xf   :  { %1616 = vmatprep.mubr.msk.bf16.mxu0 %vm132_vm0, %v89_v15  ;;  %1754 = vmatprep.subr.bf16.mxu1 %v1771_v30  ;;  %v101_v57 = vpack.c.bf16 %v54_v55, %v53_v54  ;;  %v56_v59 = vld [vmem:[%s2712_s0 + $0x118] sm:$0xff]  ;;  %v57_v60 = vld [vmem:[%s2712_s0 + $0x120] sm:$0xff]  ;;  %v58_v61 = vld [vmem:[%s2712_s0 + $0x128] sm:$0xff] }
  0x10   :  { %v102_v62 = vpack.c.bf16 %v56_v59, %v55_v58  ;;  %v103_v63 = vpack.c.bf16 %v58_v61, %v57_v60  ;;  %v59_v0 = vld [vmem:[%s2712_s0 + $0x130] sm:$0xff]  ;;  %v60_v1 = vld [vmem:[%s2712_s0 + $0x138] sm:$0xff]  ;;  %v61_v2 = vld [vmem:[%s2712_s0 + $0x140] sm:$0xff] }
  0x11   :  { %1762 = vmatpush3.bf16.msra.mxu1 %v1771_v30  ;;  %1677 = vmatpush3.bf16.msra.mxu0 %v1771_v30  ;;  %v62_v3 = vld [vmem:[%s2712_s0 + $0x148] sm:$0xff]  ;;  %v104_v4 = vpack.c.bf16 %v60_v1, %v59_v0  ;;  %v63_v6 = vld [vmem:[%s2712_s0 + $0x150] sm:$0xff]  ;;  %v64_v7 = vld [vmem:[%s2712_s0 + $0x158] sm:$0xff] }
  0x12   :  { %1755 = vmatprep.subr.bf16.mxu1 %v1772_v35  ;;  %1678 = vmatprep.subr.bf16.mxu0 %v1772_v35  ;;  %v105_v5 = vpack.c.bf16 %v62_v3, %v61_v2  ;;  %v65_v8 = vld [vmem:[%s2712_s0 + $0x160] sm:$0xff]  ;;  %v66_v9 = vld [vmem:[%s2712_s0 + $0x168] sm:$0xff]  ;;  %v106_v10 = vpack.c.bf16 %v64_v7, %v63_v6  ;;  %v67_v12 = vld [vmem:[%s2712_s0 + $0x170] sm:$0xff] }
  0x13   :  { %v107_v11 = vpack.c.bf16 %v66_v9, %v65_v8  ;;  %v68_v13 = vld [vmem:[%s2712_s0 + $0x178] sm:$0xff]  ;;  %v69_v14 = vld [vmem:[%s2712_s0 + $0x180] sm:$0xff]  ;;  %v70_v15 = vld [vmem:[%s2712_s0 + $0x188] sm:$0xff] }
  0x14   :  { %v108_v16 = vpack.c.bf16 %v68_v13, %v67_v12  ;;  %v1775_v17 = vld [vmem:[%s2713_s3 + $0x30] sm:$0xff]   ;;  %v109_v18 = vpack.c.bf16 %v70_v15, %v69_v14  ;;  %v1776_v19 = vld [vmem:[%s2713_s3 + $0x38] sm:$0xff]   ;;  %v73_v22 = vld [vmem:[%s2712_s0 + $0x1a0] sm:$0xff] }
  0x15   :  { %1763 = vmatpush3.bf16.msra.mxu1 %v1772_v35  ;;  %1679 = vmatpush3.bf16.msra.mxu0 %v1772_v35  ;;  %v74_v23 = vld [vmem:[%s2712_s0 + $0x1a8] sm:$0xff]  ;;  %v75_v26 = vld [vmem:[%s2712_s0 + $0x1b0] sm:$0xff]  ;;  %v76_v27 = vld [vmem:[%s2712_s0 + $0x1b8] sm:$0xff] }
  0x16   :  { %1617 = vmatmul.mubr.msk.bf16.gmra.mrb[8].mxu0 %vm132_vm0, %v90_v20  ;;  %1680 = vmatprep.subr.bf16.mxu0 %v1773_v38  ;;  %v71_v20 = vld [vmem:[%s2712_s0 + $0x190] sm:$0xff]  ;;  %v111_v25 = vpack.c.bf16 %v74_v23, %v73_v22  ;;  %v112_v30 = vpack.c.bf16 %v76_v27, %v75_v26  ;;  %v80_v33 = vld [vmem:[%s2712_s0 + $0x1d8] sm:$0xff]  ;;  %v81_v34 = vld [vmem:[%s2712_s0 + $0x1e0] sm:$0xff] }
  0x17   :  { %1620 = vmatprep.mubr.msk.bf16.mxu0 %vm132_vm0, %v91_v21  ;;  %1756 = vmatprep.subr.bf16.mxu1 %v1773_v38  ;;  %v72_v21 = vld [vmem:[%s2712_s0 + $0x198] sm:$0xff]  ;;  %v79_v32 = vld [vmem:[%s2712_s0 + $0x1d0] sm:$0xff]  ;;  %v82_v35 = vld [vmem:[%s2712_s0 + $0x1e8] sm:$0xff] }
  0x18   :  { %v110_v24 = vpack.c.bf16 %v72_v21, %v71_v20  ;;  %v84_v39 = vld [vmem:[%s2712_s0 + $0x1f8] sm:$0xff]  ;;  %v2318_v41 = vld [vmem:[%s2714_s2] ss:$0 sm:$0xff] }
  0x19   :  { %1764 = vmatpush3.bf16.msra.mxu1 %v1773_v38  ;;  %1681 = vmatpush3.bf16.msra.mxu0 %v1773_v38  ;;  %v83_v38 = vld [vmem:[%s2712_s0 + $0x1f0] sm:$0xff] }
  0x1a   :  { %1757 = vmatprep.subr.bf16.mxu1 %v1774_v43  ;;  %1682 = vmatprep.subr.bf16.mxu0 %v1774_v43  ;;  %v116_v40 = vpack.c.bf16 %v84_v39, %v83_v38 }
  0x1d   :  { %1765 = vmatpush3.bf16.msra.mxu1 %v1774_v43  ;;  %1683 = vmatpush3.bf16.msra.mxu0 %v1774_v43 }
  0x1e   :  { %1621 = vmatmul.mubr.msk.bf16.gmra.mrb[12].mxu0 %vm132_vm0, %v92_v28  ;;  %1684 = vmatprep.subr.bf16.mxu0 %v1775_v17  ;;  %v77_v28 = vld [vmem:[%s2712_s0 + $0x1c0] sm:$0xff] }
  0x1f   :  { %1624 = vmatprep.mubr.msk.bf16.mxu0 %vm132_vm0, %v93_v29  ;;  %1758 = vmatprep.subr.bf16.mxu1 %v1775_v17  ;;  %v78_v29 = vld [vmem:[%s2712_s0 + $0x1c8] sm:$0xff] }
  0x20   :  { %v113_v31 = vpack.c.bf16 %v78_v29, %v77_v28 }
  0x21   :  { %1685 = vmatpush3.bf16.msra.mxu0 %v1775_v17  ;;  %1766 = vmatpush3.bf16.msra.mxu1 %v1775_v17 }
  0x22   :  { %1686 = vmatprep.subr.bf16.mxu0 %v1776_v19  ;;  %1759 = vmatprep.subr.bf16.mxu1 %v1776_v19 }
  0x25   :  { %1687 = vmatpush3.bf16.msra.mxu0 %v1776_v19  ;;  %1767 = vmatpush3.bf16.msra.mxu1 %v1776_v19 }
  0x26   :  { %1625 = vmatmul.mubr.msk.bf16.gmra.mrb[16].mxu0 %vm132_vm0, %v94_v36  ;;  %v114_v36 = vpack.c.bf16 %v80_v33, %v79_v32 }
  0x27   :  { %1628 = vmatprep.mubr.msk.bf16.mxu0 %vm132_vm0, %v95_v37  ;;  %v115_v37 = vpack.c.bf16 %v82_v35, %v81_v34 }
  0x2e   :  { %1629 = vmatmul.mubr.msk.bf16.gmra.mrb[20].mxu0 %vm132_vm0, %v96_v44 }
  0x2f   :  { %1632 = vmatprep.mubr.msk.bf16.mxu0 %vm132_vm0, %v97_v45 }
  0x36   :  { %1633 = vmatmul.mubr.msk.bf16.gmra.mrb[24].mxu0 %vm132_vm0, %v98_v50 }
  0x37   :  { %1636 = vmatprep.mubr.msk.bf16.mxu0 %vm132_vm0, %v99_v51 }
  0x3e   :  { %1637 = vmatmul.mubr.msk.bf16.gmra.mrb[28].mxu0 %vm132_vm0, %v100_v56 }
  0x3f   :  { %1640 = vmatprep.mubr.msk.bf16.mxu0 %vm132_vm0, %v101_v57 }
  0x46   :  { %1641 = vmatmul.mubr.msk.bf16.gmra.mrb[32].mxu0 %vm132_vm0, %v102_v62 }
  0x47   :  { %1644 = vmatprep.mubr.msk.bf16.mxu0 %vm132_vm0, %v103_v63 }
  0x4e   :  { %1645 = vmatmul.mubr.msk.bf16.gmra.mrb[36].mxu0 %vm132_vm0, %v104_v4 }
  0x4f   :  { %1648 = vmatprep.mubr.msk.bf16.mxu0 %vm132_vm0, %v105_v5 }
  0x56   :  { %1649 = vmatmul.mubr.msk.bf16.gmra.mrb[40].mxu0 %vm132_vm0, %v106_v10 }
  0x57   :  { %1652 = vmatprep.mubr.msk.bf16.mxu0 %vm132_vm0, %v107_v11 }
  0x5e   :  { %1653 = vmatmul.mubr.msk.bf16.gmra.mrb[44].mxu0 %vm132_vm0, %v108_v16 }
  0x5f   :  { %1656 = vmatprep.mubr.msk.bf16.mxu0 %vm132_vm0, %v109_v18 }
  0x66   :  { %1657 = vmatmul.mubr.msk.bf16.gmra.mrb[48].mxu0 %vm132_vm0, %v110_v24 }
  0x67   :  { %1660 = vmatprep.mubr.msk.bf16.mxu0 %vm132_vm0, %v111_v25 }
  0x6e   :  { %1661 = vmatmul.mubr.msk.bf16.gmra.mrb[52].mxu0 %vm132_vm0, %v112_v30 }
  0x6f   :  { %1664 = vmatprep.mubr.msk.bf16.mxu0 %vm132_vm0, %v113_v31 }
  0x76   :  { %1665 = vmatmul.mubr.msk.bf16.gmra.mrb[56].mxu0 %vm132_vm0, %v114_v36 }
  0x77   :  { %1668 = vmatprep.mubr.msk.bf16.mxu0 %vm132_vm0, %v115_v37 }
  0x7e   :  { %1669 = vmatmul.mubr.msk.bf16.gmra.mrb[60].mxu0 %vm132_vm0, %v116_v40 }
  0xd9   :  { %v1610_v42 = vpop.f32.mrb[0].mxu0 }
  0xda   :  { %v272_v43 = vadd.f32 %v1610_v42, %v2318_v41  ;;  %v263_v44 = vpop.f32.mrb[1].mxu0 }
  0xdb   :  { %v264_v45 = vadd.f32 %v2318_v41, %v263_v44  ;;  %v1611_v46 = vpop.f32.mrb[2].mxu0 }
  0xdc   :  { %v275_v47 = vadd.f32 %v1611_v46, %v2318_v41  ;;  %v266_v48 = vpop.f32.mrb[3].mxu0  ;;  %v520_v50 = vmax.f32 %v272_v43, 0.0 }
  0xdd   :  { %v267_v49 = vadd.f32 %v2318_v41, %v266_v48  ;;  %v518_v52 = vmax.f32 %v264_v45, 0.0 }
  0xde   :  { %v521_v51 = vmax.f32 %v275_v47, 0.0 }
  0xdf   :  { %v519_v53 = vmax.f32 %v267_v49, 0.0 }
  0xe0   :  { %v583_v54 = vpack.c.bf16 %v521_v51, %v520_v50 }
  0xe1   :  { %v582_v55 = vpack.c.bf16 %v519_v53, %v518_v52  ;;  %v1614_v56 = vpop.f32.mrb[4].mxu0 }
  0xe2   :  { %v288_v57 = vadd.f32 %v1614_v56, %v2318_v41  ;;  %v279_v58 = vpop.f32.mrb[5].mxu0 }
  0xe3   :  { %v280_v59 = vadd.f32 %v2318_v41, %v279_v58  ;;  %v1615_v60 = vpop.f32.mrb[6].mxu0  ;;  %1688 = vmatprep.mubr.bf16.mxu0 %v582_v55 }
  0xe4   :  { %v291_v61 = vadd.f32 %v1615_v60, %v2318_v41  ;;  %v282_v62 = vpop.f32.mrb[7].mxu0  ;;  %1689 = vmatmul.mubr.bf16.vlgmr.msra.gmra.mrb[64].mxu0 %v583_v54  ;;  %v524_v0 = vmax.f32 %v288_v57, 0.0 }
  0xe5   :  { %v283_v63 = vadd.f32 %v2318_v41, %v282_v62  ;;  %v522_v2 = vmax.f32 %v280_v59, 0.0 }
  0xe6   :  { %v525_v1 = vmax.f32 %v291_v61, 0.0 }
  0xe7   :  { %v523_v3 = vmax.f32 %v283_v63, 0.0 }
  0xe8   :  { %v585_v4 = vpack.c.bf16 %v525_v1, %v524_v0 }
  0xe9   :  { %v1618_v5 = vpop.f32.mrb[8].mxu0  ;;  %v584_v6 = vpack.c.bf16 %v523_v3, %v522_v2 }
  0xea   :  { %v304_v7 = vadd.f32 %v1618_v5, %v2318_v41  ;;  %v295_v8 = vpop.f32.mrb[9].mxu0 }
  0xeb   :  { %v296_v9 = vadd.f32 %v2318_v41, %v295_v8  ;;  %v1619_v10 = vpop.f32.mrb[10].mxu0  ;;  %1692 = vmatprep.mubr.bf16.mxu1 %v584_v6 }
  0xec   :  { %v307_v11 = vadd.f32 %v1619_v10, %v2318_v41  ;;  %v298_v12 = vpop.f32.mrb[11].mxu0  ;;  %1693 = vmatmul.mubr.bf16.vlgmr.msra.gmra.mrb[0].mxu1 %v585_v4  ;;  %v528_v14 = vmax.f32 %v304_v7, 0.0 }
  0xed   :  { %v299_v13 = vadd.f32 %v2318_v41, %v298_v12  ;;  %v526_v16 = vmax.f32 %v296_v9, 0.0 }
  0xee   :  { %v529_v15 = vmax.f32 %v307_v11, 0.0 }
  0xef   :  { %v527_v17 = vmax.f32 %v299_v13, 0.0 }
  0xf0   :  { %v587_v18 = vpack.c.bf16 %v529_v15, %v528_v14 }
  0xf1   :  { %v586_v19 = vpack.c.bf16 %v527_v17, %v526_v16  ;;  %v1622_v20 = vpop.f32.mrb[12].mxu0 }
  0xf2   :  { %v320_v21 = vadd.f32 %v1622_v20, %v2318_v41  ;;  %v311_v22 = vpop.f32.mrb[13].mxu0 }
  0xf3   :  { %v312_v23 = vadd.f32 %v2318_v41, %v311_v22  ;;  %v1623_v24 = vpop.f32.mrb[14].mxu0  ;;  %1696 = vmatprep.mubr.bf16.mxu1 %v586_v19 }
  0xf4   :  { %v323_v25 = vadd.f32 %v1623_v24, %v2318_v41  ;;  %v314_v26 = vpop.f32.mrb[15].mxu0  ;;  %1697 = vmatmul.mubr.bf16.gmra.mrb[4].mxu1 %v587_v18  ;;  %v532_v28 = vmax.f32 %v320_v21, 0.0 }
  0xf5   :  { %v315_v27 = vadd.f32 %v2318_v41, %v314_v26  ;;  %v530_v30 = vmax.f32 %v312_v23, 0.0 }
  0xf6   :  { %v533_v29 = vmax.f32 %v323_v25, 0.0 }
  0xf7   :  { %v531_v31 = vmax.f32 %v315_v27, 0.0 }
  0xf8   :  { %v589_v32 = vpack.c.bf16 %v533_v29, %v532_v28 }
  0xf9   :  { %v588_v33 = vpack.c.bf16 %v531_v31, %v530_v30  ;;  %v1626_v34 = vpop.f32.mrb[16].mxu0 }
  0xfa   :  { %v336_v35 = vadd.f32 %v1626_v34, %v2318_v41  ;;  %v327_v36 = vpop.f32.mrb[17].mxu0 }
  0xfb   :  { %v328_v37 = vadd.f32 %v2318_v41, %v327_v36  ;;  %v1627_v38 = vpop.f32.mrb[18].mxu0  ;;  %1700 = vmatprep.mubr.bf16.mxu1 %v588_v33 }
  0xfc   :  { %v339_v39 = vadd.f32 %v1627_v38, %v2318_v41  ;;  %v330_v40 = vpop.f32.mrb[19].mxu0  ;;  %1701 = vmatmul.mubr.bf16.gmra.mrb[8].mxu1 %v589_v32  ;;  %v536_v43 = vmax.f32 %v336_v35, 0.0 }
  0xfd   :  { %v331_v42 = vadd.f32 %v2318_v41, %v330_v40  ;;  %v534_v45 = vmax.f32 %v328_v37, 0.0 }
  0xfe   :  { %v537_v44 = vmax.f32 %v339_v39, 0.0 }
  0xff   :  { %v535_v46 = vmax.f32 %v331_v42, 0.0 }
 0x100   :  { %v591_v47 = vpack.c.bf16 %v537_v44, %v536_v43 }
 0x101   :  { %v590_v48 = vpack.c.bf16 %v535_v46, %v534_v45  ;;  %v1630_v49 = vpop.f32.mrb[20].mxu0 }
 0x102   :  { %v352_v50 = vadd.f32 %v1630_v49, %v2318_v41  ;;  %v343_v51 = vpop.f32.mrb[21].mxu0 }
 0x103   :  { %v344_v52 = vadd.f32 %v2318_v41, %v343_v51  ;;  %v1631_v53 = vpop.f32.mrb[22].mxu0  ;;  %1704 = vmatprep.mubr.bf16.mxu1 %v590_v48 }
 0x104   :  { %v355_v54 = vadd.f32 %v1631_v53, %v2318_v41  ;;  %v346_v55 = vpop.f32.mrb[23].mxu0  ;;  %1705 = vmatmul.mubr.bf16.gmra.mrb[12].mxu1 %v591_v47  ;;  %v540_v57 = vmax.f32 %v352_v50, 0.0 }
 0x105   :  { %v347_v56 = vadd.f32 %v2318_v41, %v346_v55  ;;  %v538_v59 = vmax.f32 %v344_v52, 0.0 }
 0x106   :  { %v541_v58 = vmax.f32 %v355_v54, 0.0 }
 0x107   :  { %v539_v60 = vmax.f32 %v347_v56, 0.0 }
 0x108   :  { %v593_v61 = vpack.c.bf16 %v541_v58, %v540_v57 }
 0x109   :  { %v592_v62 = vpack.c.bf16 %v539_v60, %v538_v59  ;;  %v1634_v63 = vpop.f32.mrb[24].mxu0 }
 0x10a   :  { %v368_v0 = vadd.f32 %v1634_v63, %v2318_v41  ;;  %v359_v1 = vpop.f32.mrb[25].mxu0 }
 0x10b   :  { %v360_v2 = vadd.f32 %v2318_v41, %v359_v1  ;;  %v1635_v3 = vpop.f32.mrb[26].mxu0  ;;  %1708 = vmatprep.mubr.bf16.mxu1 %v592_v62 }
 0x10c   :  { %v371_v4 = vadd.f32 %v1635_v3, %v2318_v41  ;;  %v362_v5 = vpop.f32.mrb[27].mxu0  ;;  %1709 = vmatmul.mubr.bf16.gmra.mrb[16].mxu1 %v593_v61  ;;  %v544_v7 = vmax.f32 %v368_v0, 0.0 }
 0x10d   :  { %v363_v6 = vadd.f32 %v2318_v41, %v362_v5  ;;  %v542_v9 = vmax.f32 %v360_v2, 0.0 }
 0x10e   :  { %v545_v8 = vmax.f32 %v371_v4, 0.0 }
 0x10f   :  { %v543_v10 = vmax.f32 %v363_v6, 0.0 }
 0x110   :  { %v595_v11 = vpack.c.bf16 %v545_v8, %v544_v7 }
 0x111   :  { %v594_v12 = vpack.c.bf16 %v543_v10, %v542_v9  ;;  %v1638_v13 = vpop.f32.mrb[28].mxu0 }
 0x112   :  { %v384_v14 = vadd.f32 %v1638_v13, %v2318_v41  ;;  %v375_v15 = vpop.f32.mrb[29].mxu0 }
 0x113   :  { %v376_v16 = vadd.f32 %v2318_v41, %v375_v15  ;;  %v1639_v17 = vpop.f32.mrb[30].mxu0  ;;  %1712 = vmatprep.mubr.bf16.mxu1 %v594_v12 }
 0x114   :  { %v387_v18 = vadd.f32 %v1639_v17, %v2318_v41  ;;  %v378_v19 = vpop.f32.mrb[31].mxu0  ;;  %1713 = vmatmul.mubr.bf16.gmra.mrb[20].mxu1 %v595_v11  ;;  %v548_v21 = vmax.f32 %v384_v14, 0.0 }
 0x115   :  { %v379_v20 = vadd.f32 %v2318_v41, %v378_v19  ;;  %v546_v23 = vmax.f32 %v376_v16, 0.0 }
 0x116   :  { %v549_v22 = vmax.f32 %v387_v18, 0.0 }
 0x117   :  { %v547_v24 = vmax.f32 %v379_v20, 0.0 }
 0x118   :  { %v597_v25 = vpack.c.bf16 %v549_v22, %v548_v21 }
 0x119   :  { %v596_v26 = vpack.c.bf16 %v547_v24, %v546_v23  ;;  %v1642_v27 = vpop.f32.mrb[32].mxu0 }
 0x11a   :  { %v400_v28 = vadd.f32 %v1642_v27, %v2318_v41  ;;  %v391_v29 = vpop.f32.mrb[33].mxu0 }
 0x11b   :  { %v392_v30 = vadd.f32 %v2318_v41, %v391_v29  ;;  %v1643_v31 = vpop.f32.mrb[34].mxu0  ;;  %1716 = vmatprep.mubr.bf16.mxu1 %v596_v26 }
 0x11c   :  { %v403_v32 = vadd.f32 %v1643_v31, %v2318_v41  ;;  %v394_v33 = vpop.f32.mrb[35].mxu0  ;;  %1717 = vmatmul.mubr.bf16.gmra.mrb[24].mxu1 %v597_v25  ;;  %v552_v35 = vmax.f32 %v400_v28, 0.0 }
 0x11d   :  { %v395_v34 = vadd.f32 %v2318_v41, %v394_v33  ;;  %v550_v37 = vmax.f32 %v392_v30, 0.0 }
 0x11e   :  { %v553_v36 = vmax.f32 %v403_v32, 0.0 }
 0x11f   :  { %v551_v38 = vmax.f32 %v395_v34, 0.0 }
 0x120   :  { %v599_v39 = vpack.c.bf16 %v553_v36, %v552_v35 }
 0x121   :  { %v598_v40 = vpack.c.bf16 %v551_v38, %v550_v37  ;;  %v1646_v42 = vpop.f32.mrb[36].mxu0 }
 0x122   :  { %v416_v43 = vadd.f32 %v1646_v42, %v2318_v41  ;;  %v407_v44 = vpop.f32.mrb[37].mxu0 }
 0x123   :  { %v408_v45 = vadd.f32 %v2318_v41, %v407_v44  ;;  %v1647_v46 = vpop.f32.mrb[38].mxu0  ;;  %1720 = vmatprep.mubr.bf16.mxu1 %v598_v40 }
 0x124   :  { %v419_v47 = vadd.f32 %v1647_v46, %v2318_v41  ;;  %v410_v48 = vpop.f32.mrb[39].mxu0  ;;  %1721 = vmatmul.mubr.bf16.gmra.mrb[28].mxu1 %v599_v39  ;;  %v556_v50 = vmax.f32 %v416_v43, 0.0 }
 0x125   :  { %v411_v49 = vadd.f32 %v2318_v41, %v410_v48  ;;  %v554_v52 = vmax.f32 %v408_v45, 0.0 }
 0x126   :  { %v557_v51 = vmax.f32 %v419_v47, 0.0 }
 0x127   :  { %v555_v53 = vmax.f32 %v411_v49, 0.0 }
 0x128   :  { %v601_v54 = vpack.c.bf16 %v557_v51, %v556_v50 }
 0x129   :  { %v600_v55 = vpack.c.bf16 %v555_v53, %v554_v52  ;;  %v1650_v56 = vpop.f32.mrb[40].mxu0 }
 0x12a   :  { %v432_v57 = vadd.f32 %v1650_v56, %v2318_v41  ;;  %v423_v58 = vpop.f32.mrb[41].mxu0 }
 0x12b   :  { %v424_v59 = vadd.f32 %v2318_v41, %v423_v58  ;;  %v1651_v60 = vpop.f32.mrb[42].mxu0  ;;  %1724 = vmatprep.mubr.bf16.mxu1 %v600_v55 }
 0x12c   :  { %v435_v61 = vadd.f32 %v1651_v60, %v2318_v41  ;;  %v426_v62 = vpop.f32.mrb[43].mxu0  ;;  %1725 = vmatmul.mubr.bf16.gmra.mrb[32].mxu1 %v601_v54  ;;  %v560_v0 = vmax.f32 %v432_v57, 0.0 }
 0x12d   :  { %v427_v63 = vadd.f32 %v2318_v41, %v426_v62  ;;  %v558_v2 = vmax.f32 %v424_v59, 0.0 }
 0x12e   :  { %v561_v1 = vmax.f32 %v435_v61, 0.0 }
 0x12f   :  { %v559_v3 = vmax.f32 %v427_v63, 0.0 }
 0x130   :  { %v603_v4 = vpack.c.bf16 %v561_v1, %v560_v0 }
 0x131   :  { %v602_v5 = vpack.c.bf16 %v559_v3, %v558_v2  ;;  %v1654_v6 = vpop.f32.mrb[44].mxu0 }
 0x132   :  { %v448_v7 = vadd.f32 %v1654_v6, %v2318_v41  ;;  %v439_v8 = vpop.f32.mrb[45].mxu0 }
 0x133   :  { %v440_v9 = vadd.f32 %v2318_v41, %v439_v8  ;;  %v1655_v10 = vpop.f32.mrb[46].mxu0  ;;  %1728 = vmatprep.mubr.bf16.mxu1 %v602_v5 }
 0x134   :  { %v451_v11 = vadd.f32 %v1655_v10, %v2318_v41  ;;  %v442_v12 = vpop.f32.mrb[47].mxu0  ;;  %1729 = vmatmul.mubr.bf16.gmra.mrb[36].mxu1 %v603_v4  ;;  %v564_v14 = vmax.f32 %v448_v7, 0.0 }
 0x135   :  { %v443_v13 = vadd.f32 %v2318_v41, %v442_v12  ;;  %v562_v16 = vmax.f32 %v440_v9, 0.0 }
 0x136   :  { %v565_v15 = vmax.f32 %v451_v11, 0.0 }
 0x137   :  { %v563_v17 = vmax.f32 %v443_v13, 0.0  ;;  %v2387_v13 = vld [vmem:[%s2715_s4] ss:$0 sm:$0xff] }
 0x138   :  { %v605_v18 = vpack.c.bf16 %v565_v15, %v564_v14 }
 0x139   :  { %v604_v19 = vpack.c.bf16 %v563_v17, %v562_v16  ;;  %v1658_v20 = vpop.f32.mrb[48].mxu0 }
 0x13a   :  { %v464_v21 = vadd.f32 %v1658_v20, %v2318_v41  ;;  %v455_v22 = vpop.f32.mrb[49].mxu0 }
 0x13b   :  { %v456_v23 = vadd.f32 %v2318_v41, %v455_v22  ;;  %v1659_v24 = vpop.f32.mrb[50].mxu0  ;;  %1732 = vmatprep.mubr.bf16.mxu1 %v604_v19 }
 0x13c   :  { %v467_v25 = vadd.f32 %v1659_v24, %v2318_v41  ;;  %v458_v26 = vpop.f32.mrb[51].mxu0  ;;  %1733 = vmatmul.mubr.bf16.gmra.mrb[40].mxu1 %v605_v18  ;;  %v568_v28 = vmax.f32 %v464_v21, 0.0 }
 0x13d   :  { %v459_v27 = vadd.f32 %v2318_v41, %v458_v26  ;;  %v566_v30 = vmax.f32 %v456_v23, 0.0 }
 0x13e   :  { %v569_v29 = vmax.f32 %v467_v25, 0.0 }
 0x13f   :  { %v567_v31 = vmax.f32 %v459_v27, 0.0 }
 0x140   :  { %v607_v32 = vpack.c.bf16 %v569_v29, %v568_v28 }
 0x141   :  { %v606_v33 = vpack.c.bf16 %v567_v31, %v566_v30  ;;  %v1662_v34 = vpop.f32.mrb[52].mxu0 }
 0x142   :  { %v480_v35 = vadd.f32 %v1662_v34, %v2318_v41  ;;  %v471_v36 = vpop.f32.mrb[53].mxu0 }
 0x143   :  { %v472_v37 = vadd.f32 %v2318_v41, %v471_v36  ;;  %v1663_v38 = vpop.f32.mrb[54].mxu0  ;;  %1736 = vmatprep.mubr.bf16.mxu1 %v606_v33 }
 0x144   :  { %v483_v39 = vadd.f32 %v1663_v38, %v2318_v41  ;;  %v474_v40 = vpop.f32.mrb[55].mxu0  ;;  %1737 = vmatmul.mubr.bf16.gmra.mrb[44].mxu1 %v607_v32  ;;  %v572_v43 = vmax.f32 %v480_v35, 0.0 }
 0x145   :  { %v475_v42 = vadd.f32 %v2318_v41, %v474_v40  ;;  %v570_v45 = vmax.f32 %v472_v37, 0.0 }
 0x146   :  { %v573_v44 = vmax.f32 %v483_v39, 0.0 }
 0x147   :  { %v571_v46 = vmax.f32 %v475_v42, 0.0 }
 0x148   :  { %v609_v47 = vpack.c.bf16 %v573_v44, %v572_v43 }
 0x149   :  { %v608_v48 = vpack.c.bf16 %v571_v46, %v570_v45  ;;  %v1666_v49 = vpop.f32.mrb[56].mxu0 }
 0x14a   :  { %v496_v50 = vadd.f32 %v1666_v49, %v2318_v41  ;;  %v487_v51 = vpop.f32.mrb[57].mxu0 }
 0x14b   :  { %v488_v52 = vadd.f32 %v2318_v41, %v487_v51  ;;  %v1667_v53 = vpop.f32.mrb[58].mxu0  ;;  %1740 = vmatprep.mubr.bf16.mxu1 %v608_v48 }
 0x14c   :  { %v499_v54 = vadd.f32 %v1667_v53, %v2318_v41  ;;  %v490_v55 = vpop.f32.mrb[59].mxu0  ;;  %1741 = vmatmul.mubr.bf16.gmra.mrb[48].mxu1 %v609_v47  ;;  %v576_v57 = vmax.f32 %v496_v50, 0.0 }
 0x14d   :  { %v491_v56 = vadd.f32 %v2318_v41, %v490_v55  ;;  %v574_v59 = vmax.f32 %v488_v52, 0.0 }
 0x14e   :  { %v577_v58 = vmax.f32 %v499_v54, 0.0 }
 0x14f   :  { %v575_v60 = vmax.f32 %v491_v56, 0.0 }
 0x150   :  { %v611_v61 = vpack.c.bf16 %v577_v58, %v576_v57 }
 0x151   :  { %v610_v62 = vpack.c.bf16 %v575_v60, %v574_v59  ;;  %v1670_v63 = vpop.f32.mrb[60].mxu0 }
 0x152   :  { %v512_v0 = vadd.f32 %v1670_v63, %v2318_v41  ;;  %v503_v1 = vpop.f32.mrb[61].mxu0 }
 0x153   :  { %v504_v2 = vadd.f32 %v2318_v41, %v503_v1  ;;  %v1671_v3 = vpop.f32.mrb[62].mxu0  ;;  %1744 = vmatprep.mubr.bf16.mxu1 %v610_v62 }
 0x154   :  { %v515_v4 = vadd.f32 %v1671_v3, %v2318_v41  ;;  %v506_v5 = vpop.f32.mrb[63].mxu0  ;;  %1745 = vmatmul.mubr.bf16.gmra.mrb[52].mxu1 %v611_v61  ;;  %v580_v7 = vmax.f32 %v512_v0, 0.0 }
 0x155   :  { %v507_v6 = vadd.f32 %v2318_v41, %v506_v5  ;;  %v578_v9 = vmax.f32 %v504_v2, 0.0 }
 0x156   :  { %v581_v8 = vmax.f32 %v515_v4, 0.0 }
 0x157   :  { %v579_v10 = vmax.f32 %v507_v6, 0.0 }
 0x158   :  { %v613_v11 = vpack.c.bf16 %v581_v8, %v580_v7 }
 0x159   :  { %v612_v12 = vpack.c.bf16 %v579_v10, %v578_v9 }
 0x15b   :  { %1748 = vmatprep.mubr.bf16.mxu1 %v612_v12 }
 0x15c   :  { %1749 = vmatmul.mubr.bf16.gmra.mrb[56].mxu1 %v613_v11 }
 0x1b7   :  { %v1690_v14 = vpop.f32.mrb[64].mxu0 }
 0x1b8   :  { %v728_v15 = vadd.f32 %v1690_v14, %v2387_v13  ;;  %v719_v16 = vpop.f32.mrb[65].mxu0 }
 0x1b9   :  { %v720_v17 = vadd.f32 %v2387_v13, %v719_v16  ;;  %v1691_v41 = vpop.f32.mrb[66].mxu0 }
 0x1ba   :  { %v1471_v18 = vmul.f32 -1.442695, %v728_v15  ;;  %v731_v19 = vadd.f32 %v1691_v41, %v2387_v13  ;;  %v722_v20 = vpop.f32.mrb[67].mxu0 }
 0x1bb   :  { %v1469_v21 = vmul.f32 -1.442695, %v720_v17  ;;  %v723_v22 = vadd.f32 %v2387_v13, %v722_v20 }
 0x1bc   :  { %1777 = vpow2.f32 %v1471_v18  ;;  %v1472_v23 = vmul.f32 -1.442695, %v731_v19 }
 0x1bd   :  { %1779 = vpow2.f32 %v1469_v21  ;;  %v1470_v24 = vmul.f32 -1.442695, %v723_v22 }
 0x1be   :  { %1781 = vpow2.f32 %v1472_v23 }
 0x1bf   :  { %1783 = vpow2.f32 %v1470_v24  ;;  %v1694_v25 = vpop.f32.mrb[0].mxu1 }
 0x1c0   :  { %v744_v26 = vadd.f32 %v1694_v25, %v2387_v13  ;;  %v735_v27 = vpop.f32.mrb[1].mxu1 }
 0x1c1   :  { %v736_v28 = vadd.f32 %v2387_v13, %v735_v27  ;;  %v1695_v29 = vpop.f32.mrb[2].mxu1 }
 0x1c2   :  { %v1475_v30 = vmul.f32 -1.442695, %v744_v26  ;;  %v747_v31 = vadd.f32 %v1695_v29, %v2387_v13  ;;  %v738_v32 = vpop.f32.mrb[3].mxu1 }
 0x1c3   :  { %v1473_v33 = vmul.f32 -1.442695, %v736_v28  ;;  %v739_v34 = vadd.f32 %v2387_v13, %v738_v32 }
 0x1c4   :  { %1785 = vpow2.f32 %v1475_v30  ;;  %v1476_v35 = vmul.f32 -1.442695, %v747_v31 }
 0x1c5   :  { %1787 = vpow2.f32 %v1473_v33  ;;  %v1474_v36 = vmul.f32 -1.442695, %v739_v34 }
 0x1c6   :  { %v1778_v37 = vpop.eup %1777  ;;  %1789 = vpow2.f32 %v1476_v35 }
 0x1c7   :  { %v1780_v38 = vpop.eup %1779  ;;  %v1168_v39 = vadd.f32 1.0, %v1778_v37  ;;  %1791 = vpow2.f32 %v1474_v36  ;;  %v1698_v40 = vpop.f32.mrb[4].mxu1 }
 0x1c8   :  { %v1782_v42 = vpop.eup %1781  ;;  %v1166_v43 = vadd.f32 1.0, %v1780_v38  ;;  %v760_v44 = vadd.f32 %v1698_v40, %v2387_v13  ;;  %v751_v45 = vpop.f32.mrb[5].mxu1 }
 0x1c9   :  { %v1784_v46 = vpop.eup %1783  ;;  %1793 = vrcp.f32 %v1168_v39  ;;  %v1169_v47 = vadd.f32 1.0, %v1782_v42  ;;  %v752_v48 = vadd.f32 %v2387_v13, %v751_v45  ;;  %v1699_v49 = vpop.f32.mrb[6].mxu1 }
 0x1ca   :  { %1795 = vrcp.f32 %v1166_v43  ;;  %v1167_v50 = vadd.f32 1.0, %v1784_v46  ;;  %v1479_v51 = vmul.f32 -1.442695, %v760_v44  ;;  %v763_v52 = vadd.f32 %v1699_v49, %v2387_v13  ;;  %v754_v53 = vpop.f32.mrb[7].mxu1 }
 0x1cb   :  { %1797 = vrcp.f32 %v1169_v47  ;;  %v1477_v54 = vmul.f32 -1.442695, %v752_v48  ;;  %v755_v55 = vadd.f32 %v2387_v13, %v754_v53 }
 0x1cc   :  { %1799 = vrcp.f32 %v1167_v50  ;;  %v1480_v56 = vmul.f32 -1.442695, %v763_v52 }
 0x1cd   :  { %1801 = vpow2.f32 %v1479_v51  ;;  %v1478_v57 = vmul.f32 -1.442695, %v755_v55 }
 0x1ce   :  { %v1786_v58 = vpop.eup %1785  ;;  %1803 = vpow2.f32 %v1477_v54 }
 0x1cf   :  { %v1788_v59 = vpop.eup %1787  ;;  %v1172_v60 = vadd.f32 1.0, %v1786_v58  ;;  %1805 = vpow2.f32 %v1480_v56  ;;  %v1702_v61 = vpop.f32.mrb[8].mxu1 }
 0x1d0   :  { %v1790_v62 = vpop.eup %1789  ;;  %v1170_v63 = vadd.f32 1.0, %v1788_v59  ;;  %1807 = vpow2.f32 %v1478_v57  ;;  %v776_v0 = vadd.f32 %v1702_v61, %v2387_v13  ;;  %v767_v1 = vpop.f32.mrb[9].mxu1 }
 0x1d1   :  { %v1792_v2 = vpop.eup %1791  ;;  %1809 = vrcp.f32 %v1172_v60  ;;  %v1173_v3 = vadd.f32 1.0, %v1790_v62  ;;  %v768_v4 = vadd.f32 %v2387_v13, %v767_v1  ;;  %v1703_v5 = vpop.f32.mrb[10].mxu1 }
 0x1d2   :  { %1811 = vrcp.f32 %v1170_v63  ;;  %v1171_v6 = vadd.f32 1.0, %v1792_v2  ;;  %v1483_v7 = vmul.f32 -1.442695, %v776_v0  ;;  %v779_v8 = vadd.f32 %v1703_v5, %v2387_v13  ;;  %v770_v9 = vpop.f32.mrb[11].mxu1 }
 0x1d3   :  { %v1794_v10 = vpop.eup %1793  ;;  %1813 = vrcp.f32 %v1173_v3  ;;  %v1481_v11 = vmul.f32 -1.442695, %v768_v4  ;;  %v771_v12 = vadd.f32 %v2387_v13, %v770_v9 }
 0x1d4   :  { %v1796_v14 = vpop.eup %1795  ;;  %1360 = vst.msk [vmem:[%s2716_s5 + $0x10] sm:$0xff] %vm132_vm0, %v1794_v10  ;;  %1815 = vrcp.f32 %v1171_v6  ;;  %v1484_v15 = vmul.f32 -1.442695, %v779_v8 }
 0x1d5   :  { %v1798_v16 = vpop.eup %1797  ;;  %1358 = vst.msk [vmem:[%s2716_s5] sm:$0xff] %vm132_vm0, %v1796_v14  ;;  %1817 = vpow2.f32 %v1483_v7  ;;  %v1482_v17 = vmul.f32 -1.442695, %v771_v12 }
 0x1d6   :  { %v1800_v41 = vpop.eup %1799  ;;  %1361 = vst.msk [vmem:[%s2716_s5 + $0x18] sm:$0xff] %vm132_vm0, %v1798_v16  ;;  %1819 = vpow2.f32 %v1481_v11 }
 0x1d7   :  { %v1802_v18 = vpop.eup %1801  ;;  %1359 = vst.msk [vmem:[%s2716_s5 + $0x8] sm:$0xff] %vm132_vm0, %v1800_v41  ;;  %1821 = vpow2.f32 %v1484_v15  ;;  %v1706_v19 = vpop.f32.mrb[12].mxu1 }
 0x1d8   :  { %v1804_v20 = vpop.eup %1803  ;;  %v1176_v21 = vadd.f32 1.0, %v1802_v18  ;;  %1823 = vpow2.f32 %v1482_v17  ;;  %v792_v22 = vadd.f32 %v1706_v19, %v2387_v13  ;;  %v783_v23 = vpop.f32.mrb[13].mxu1 }
 0x1d9   :  { %v1806_v24 = vpop.eup %1805  ;;  %v1174_v25 = vadd.f32 1.0, %v1804_v20  ;;  %v784_v26 = vadd.f32 %v2387_v13, %v783_v23  ;;  %v1707_v27 = vpop.f32.mrb[14].mxu1 }
 0x1da   :  { %v1808_v28 = vpop.eup %1807  ;;  %1825 = vrcp.f32 %v1176_v21  ;;  %v1177_v29 = vadd.f32 1.0, %v1806_v24  ;;  %v1487_v30 = vmul.f32 -1.442695, %v792_v22  ;;  %v795_v31 = vadd.f32 %v1707_v27, %v2387_v13  ;;  %v786_v32 = vpop.f32.mrb[15].mxu1 }
 0x1db   :  { %v1810_v33 = vpop.eup %1809  ;;  %1827 = vrcp.f32 %v1174_v25  ;;  %v1175_v34 = vadd.f32 1.0, %v1808_v28  ;;  %v1485_v35 = vmul.f32 -1.442695, %v784_v26  ;;  %v787_v36 = vadd.f32 %v2387_v13, %v786_v32 }
 0x1dc   :  { %v1812_v37 = vpop.eup %1811  ;;  %1364 = vst.msk [vmem:[%s2716_s5 + $0x30] sm:$0xff] %vm132_vm0, %v1810_v33  ;;  %1829 = vrcp.f32 %v1177_v29  ;;  %v1488_v38 = vmul.f32 -1.442695, %v795_v31 }
 0x1dd   :  { %v1814_v39 = vpop.eup %1813  ;;  %1362 = vst.msk [vmem:[%s2716_s5 + $0x20] sm:$0xff] %vm132_vm0, %v1812_v37  ;;  %1831 = vrcp.f32 %v1175_v34  ;;  %v1486_v40 = vmul.f32 -1.442695, %v787_v36 }
 0x1de   :  { %v1816_v42 = vpop.eup %1815  ;;  %1365 = vst.msk [vmem:[%s2716_s5 + $0x38] sm:$0xff] %vm132_vm0, %v1814_v39  ;;  %1833 = vpow2.f32 %v1487_v30 }
 0x1df   :  { %v1818_v43 = vpop.eup %1817  ;;  %1363 = vst.msk [vmem:[%s2716_s5 + $0x28] sm:$0xff] %vm132_vm0, %v1816_v42  ;;  %1835 = vpow2.f32 %v1485_v35  ;;  %v1710_v44 = vpop.f32.mrb[16].mxu1 }
 0x1e0   :  { %v1820_v45 = vpop.eup %1819  ;;  %v1180_v46 = vadd.f32 1.0, %v1818_v43  ;;  %1837 = vpow2.f32 %v1488_v38  ;;  %v808_v47 = vadd.f32 %v1710_v44, %v2387_v13  ;;  %v799_v48 = vpop.f32.mrb[17].mxu1 }
 0x1e1   :  { %v1822_v49 = vpop.eup %1821  ;;  %v1178_v50 = vadd.f32 1.0, %v1820_v45  ;;  %1839 = vpow2.f32 %v1486_v40  ;;  %v800_v51 = vadd.f32 %v2387_v13, %v799_v48  ;;  %v1711_v52 = vpop.f32.mrb[18].mxu1 }
 0x1e2   :  { %v1824_v53 = vpop.eup %1823  ;;  %1841 = vrcp.f32 %v1180_v46  ;;  %v1181_v54 = vadd.f32 1.0, %v1822_v49  ;;  %v1491_v55 = vmul.f32 -1.442695, %v808_v47  ;;  %v811_v56 = vadd.f32 %v1711_v52, %v2387_v13  ;;  %v802_v57 = vpop.f32.mrb[19].mxu1 }
 0x1e3   :  { %1843 = vrcp.f32 %v1178_v50  ;;  %v1179_v58 = vadd.f32 1.0, %v1824_v53  ;;  %v1489_v59 = vmul.f32 -1.442695, %v800_v51  ;;  %v803_v60 = vadd.f32 %v2387_v13, %v802_v57 }
 0x1e4   :  { %v1826_v61 = vpop.eup %1825  ;;  %1845 = vrcp.f32 %v1181_v54  ;;  %v1492_v62 = vmul.f32 -1.442695, %v811_v56 }
 0x1e5   :  { %v1828_v63 = vpop.eup %1827  ;;  %1368 = vst.msk [vmem:[%s2716_s5 + $0x50] sm:$0xff] %vm132_vm0, %v1826_v61  ;;  %1847 = vrcp.f32 %v1179_v58  ;;  %v1490_v0 = vmul.f32 -1.442695, %v803_v60 }
 0x1e6   :  { %v1830_v1 = vpop.eup %1829  ;;  %1366 = vst.msk [vmem:[%s2716_s5 + $0x40] sm:$0xff] %vm132_vm0, %v1828_v63  ;;  %1849 = vpow2.f32 %v1491_v55 }
 0x1e7   :  { %v1832_v2 = vpop.eup %1831  ;;  %1369 = vst.msk [vmem:[%s2716_s5 + $0x58] sm:$0xff] %vm132_vm0, %v1830_v1  ;;  %1851 = vpow2.f32 %v1489_v59  ;;  %v1714_v3 = vpop.f32.mrb[20].mxu1 }
 0x1e8   :  { %v1834_v4 = vpop.eup %1833  ;;  %1367 = vst.msk [vmem:[%s2716_s5 + $0x48] sm:$0xff] %vm132_vm0, %v1832_v2  ;;  %1853 = vpow2.f32 %v1492_v62  ;;  %v824_v5 = vadd.f32 %v1714_v3, %v2387_v13  ;;  %v815_v6 = vpop.f32.mrb[21].mxu1 }
 0x1e9   :  { %v1836_v7 = vpop.eup %1835  ;;  %v1184_v8 = vadd.f32 1.0, %v1834_v4  ;;  %1855 = vpow2.f32 %v1490_v0  ;;  %v816_v9 = vadd.f32 %v2387_v13, %v815_v6  ;;  %v1715_v10 = vpop.f32.mrb[22].mxu1 }
 0x1ea   :  { %v1838_v11 = vpop.eup %1837  ;;  %v1182_v12 = vadd.f32 1.0, %v1836_v7  ;;  %v827_v14 = vadd.f32 %v1715_v10, %v2387_v13  ;;  %v818_v15 = vpop.f32.mrb[23].mxu1  ;;  %v1495_v41 = vmul.f32 -1.442695, %v824_v5 }
 0x1eb   :  { %v1840_v16 = vpop.eup %1839  ;;  %1857 = vrcp.f32 %v1184_v8  ;;  %v1185_v17 = vadd.f32 1.0, %v1838_v11  ;;  %v819_v18 = vadd.f32 %v2387_v13, %v818_v15  ;;  %v1493_v21 = vmul.f32 -1.442695, %v816_v9 }
 0x1ec   :  { %v1842_v19 = vpop.eup %1841  ;;  %1859 = vrcp.f32 %v1182_v12  ;;  %v1183_v20 = vadd.f32 1.0, %v1840_v16  ;;  %v1496_v23 = vmul.f32 -1.442695, %v827_v14 }
 0x1ed   :  { %v1844_v22 = vpop.eup %1843  ;;  %1372 = vst.msk [vmem:[%s2716_s5 + $0x70] sm:$0xff] %vm132_vm0, %v1842_v19  ;;  %1861 = vrcp.f32 %v1185_v17  ;;  %v1494_v25 = vmul.f32 -1.442695, %v819_v18 }
 0x1ee   :  { %v1846_v24 = vpop.eup %1845  ;;  %1370 = vst.msk [vmem:[%s2716_s5 + $0x60] sm:$0xff] %vm132_vm0, %v1844_v22  ;;  %1863 = vrcp.f32 %v1183_v20 }
 0x1ef   :  { %v1848_v26 = vpop.eup %1847  ;;  %1373 = vst.msk [vmem:[%s2716_s5 + $0x78] sm:$0xff] %vm132_vm0, %v1846_v24  ;;  %1865 = vpow2.f32 %v1495_v41  ;;  %v1718_v27 = vpop.f32.mrb[24].mxu1 }
 0x1f0   :  { %v1850_v28 = vpop.eup %1849  ;;  %1371 = vst.msk [vmem:[%s2716_s5 + $0x68] sm:$0xff] %vm132_vm0, %v1848_v26  ;;  %1867 = vpow2.f32 %v1493_v21  ;;  %v840_v29 = vadd.f32 %v1718_v27, %v2387_v13  ;;  %v831_v30 = vpop.f32.mrb[25].mxu1 }
 0x1f1   :  { %v1852_v31 = vpop.eup %1851  ;;  %v1188_v32 = vadd.f32 1.0, %v1850_v28  ;;  %1869 = vpow2.f32 %v1496_v23  ;;  %v832_v33 = vadd.f32 %v2387_v13, %v831_v30  ;;  %v1719_v34 = vpop.f32.mrb[26].mxu1 }
 0x1f2   :  { %v1854_v35 = vpop.eup %1853  ;;  %v1186_v36 = vadd.f32 1.0, %v1852_v31  ;;  %1871 = vpow2.f32 %v1494_v25  ;;  %v843_v37 = vadd.f32 %v1719_v34, %v2387_v13  ;;  %v834_v38 = vpop.f32.mrb[27].mxu1  ;;  %v1499_v42 = vmul.f32 -1.442695, %v840_v29 }
 0x1f3   :  { %v1856_v39 = vpop.eup %1855  ;;  %1873 = vrcp.f32 %v1188_v32  ;;  %v1189_v40 = vadd.f32 1.0, %v1854_v35  ;;  %v835_v43 = vadd.f32 %v2387_v13, %v834_v38  ;;  %v1497_v45 = vmul.f32 -1.442695, %v832_v33 }
 0x1f4   :  { %1875 = vrcp.f32 %v1186_v36  ;;  %v1187_v44 = vadd.f32 1.0, %v1856_v39  ;;  %v1500_v47 = vmul.f32 -1.442695, %v843_v37 }
 0x1f5   :  { %v1858_v46 = vpop.eup %1857  ;;  %1877 = vrcp.f32 %v1189_v40  ;;  %v1498_v49 = vmul.f32 -1.442695, %v835_v43 }
 0x1f6   :  { %v1860_v48 = vpop.eup %1859  ;;  %1376 = vst.msk [vmem:[%s2716_s5 + $0x90] sm:$0xff] %vm132_vm0, %v1858_v46  ;;  %1879 = vrcp.f32 %v1187_v44 }
 0x1f7   :  { %v1862_v50 = vpop.eup %1861  ;;  %1374 = vst.msk [vmem:[%s2716_s5 + $0x80] sm:$0xff] %vm132_vm0, %v1860_v48  ;;  %1881 = vpow2.f32 %v1499_v42  ;;  %v1722_v51 = vpop.f32.mrb[28].mxu1 }
 0x1f8   :  { %v1864_v52 = vpop.eup %1863  ;;  %1377 = vst.msk [vmem:[%s2716_s5 + $0x98] sm:$0xff] %vm132_vm0, %v1862_v50  ;;  %1883 = vpow2.f32 %v1497_v45  ;;  %v856_v53 = vadd.f32 %v1722_v51, %v2387_v13  ;;  %v847_v54 = vpop.f32.mrb[29].mxu1 }
 0x1f9   :  { %v1866_v55 = vpop.eup %1865  ;;  %1375 = vst.msk [vmem:[%s2716_s5 + $0x88] sm:$0xff] %vm132_vm0, %v1864_v52  ;;  %1885 = vpow2.f32 %v1500_v47  ;;  %v848_v56 = vadd.f32 %v2387_v13, %v847_v54  ;;  %v1723_v57 = vpop.f32.mrb[30].mxu1 }
 0x1fa   :  { %v1868_v58 = vpop.eup %1867  ;;  %v1192_v59 = vadd.f32 1.0, %v1866_v55  ;;  %1887 = vpow2.f32 %v1498_v49  ;;  %v859_v60 = vadd.f32 %v1723_v57, %v2387_v13  ;;  %v850_v61 = vpop.f32.mrb[31].mxu1  ;;  %v1503_v3 = vmul.f32 -1.442695, %v856_v53 }
 0x1fb   :  { %v1870_v62 = vpop.eup %1869  ;;  %v1190_v63 = vadd.f32 1.0, %v1868_v58  ;;  %v851_v0 = vadd.f32 %v2387_v13, %v850_v61  ;;  %v1501_v6 = vmul.f32 -1.442695, %v848_v56 }
 0x1fc   :  { %v1872_v1 = vpop.eup %1871  ;;  %1889 = vrcp.f32 %v1192_v59  ;;  %v1193_v2 = vadd.f32 1.0, %v1870_v62  ;;  %v1504_v8 = vmul.f32 -1.442695, %v859_v60 }
 0x1fd   :  { %v1874_v4 = vpop.eup %1873  ;;  %1891 = vrcp.f32 %v1190_v63  ;;  %v1191_v5 = vadd.f32 1.0, %v1872_v1  ;;  %v1502_v10 = vmul.f32 -1.442695, %v851_v0 }
 0x1fe   :  { %v1876_v7 = vpop.eup %1875  ;;  %1380 = vst.msk [vmem:[%s2716_s5 + $0xb0] sm:$0xff] %vm132_vm0, %v1874_v4  ;;  %1893 = vrcp.f32 %v1193_v2 }
 0x1ff   :  { %v1878_v9 = vpop.eup %1877  ;;  %1378 = vst.msk [vmem:[%s2716_s5 + $0xa0] sm:$0xff] %vm132_vm0, %v1876_v7  ;;  %1895 = vrcp.f32 %v1191_v5  ;;  %v1726_v11 = vpop.f32.mrb[32].mxu1 }
 0x200   :  { %v1880_v12 = vpop.eup %1879  ;;  %1381 = vst.msk [vmem:[%s2716_s5 + $0xb8] sm:$0xff] %vm132_vm0, %v1878_v9  ;;  %1897 = vpow2.f32 %v1503_v3  ;;  %v872_v14 = vadd.f32 %v1726_v11, %v2387_v13  ;;  %v863_v15 = vpop.f32.mrb[33].mxu1 }
 0x201   :  { %v1882_v16 = vpop.eup %1881  ;;  %1379 = vst.msk [vmem:[%s2716_s5 + $0xa8] sm:$0xff] %vm132_vm0, %v1880_v12  ;;  %1899 = vpow2.f32 %v1501_v6  ;;  %v864_v17 = vadd.f32 %v2387_v13, %v863_v15  ;;  %v1727_v41 = vpop.f32.mrb[34].mxu1 }
 0x202   :  { %v1884_v18 = vpop.eup %1883  ;;  %v1196_v19 = vadd.f32 1.0, %v1882_v16  ;;  %1901 = vpow2.f32 %v1504_v8  ;;  %v875_v20 = vadd.f32 %v1727_v41, %v2387_v13  ;;  %v866_v21 = vpop.f32.mrb[35].mxu1  ;;  %v1507_v27 = vmul.f32 -1.442695, %v872_v14 }
 0x203   :  { %v1886_v22 = vpop.eup %1885  ;;  %v1194_v23 = vadd.f32 1.0, %v1884_v18  ;;  %1903 = vpow2.f32 %v1502_v10  ;;  %v867_v24 = vadd.f32 %v2387_v13, %v866_v21  ;;  %v1505_v29 = vmul.f32 -1.442695, %v864_v17 }
 0x204   :  { %v1888_v25 = vpop.eup %1887  ;;  %1905 = vrcp.f32 %v1196_v19  ;;  %v1197_v26 = vadd.f32 1.0, %v1886_v22  ;;  %v1508_v31 = vmul.f32 -1.442695, %v875_v20 }
 0x205   :  { %1907 = vrcp.f32 %v1194_v23  ;;  %v1195_v28 = vadd.f32 1.0, %v1888_v25  ;;  %v1506_v33 = vmul.f32 -1.442695, %v867_v24 }
 0x206   :  { %v1890_v30 = vpop.eup %1889  ;;  %1909 = vrcp.f32 %v1197_v26 }
 0x207   :  { %v1892_v32 = vpop.eup %1891  ;;  %1384 = vst.msk [vmem:[%s2716_s5 + $0xd0] sm:$0xff] %vm132_vm0, %v1890_v30  ;;  %1911 = vrcp.f32 %v1195_v28  ;;  %v1730_v34 = vpop.f32.mrb[36].mxu1 }
 0x208   :  { %v1894_v35 = vpop.eup %1893  ;;  %1382 = vst.msk [vmem:[%s2716_s5 + $0xc0] sm:$0xff] %vm132_vm0, %v1892_v32  ;;  %1913 = vpow2.f32 %v1507_v27  ;;  %v888_v36 = vadd.f32 %v1730_v34, %v2387_v13  ;;  %v879_v37 = vpop.f32.mrb[37].mxu1 }
 0x209   :  { %v1896_v38 = vpop.eup %1895  ;;  %1385 = vst.msk [vmem:[%s2716_s5 + $0xd8] sm:$0xff] %vm132_vm0, %v1894_v35  ;;  %1915 = vpow2.f32 %v1505_v29  ;;  %v880_v39 = vadd.f32 %v2387_v13, %v879_v37  ;;  %v1731_v40 = vpop.f32.mrb[38].mxu1 }
 0x20a   :  { %v1898_v42 = vpop.eup %1897  ;;  %1383 = vst.msk [vmem:[%s2716_s5 + $0xc8] sm:$0xff] %vm132_vm0, %v1896_v38  ;;  %1917 = vpow2.f32 %v1508_v31  ;;  %v1511_v43 = vmul.f32 -1.442695, %v888_v36  ;;  %v891_v44 = vadd.f32 %v1731_v40, %v2387_v13  ;;  %v882_v45 = vpop.f32.mrb[39].mxu1 }
 0x20b   :  { %v1900_v46 = vpop.eup %1899  ;;  %v1200_v47 = vadd.f32 1.0, %v1898_v42  ;;  %1919 = vpow2.f32 %v1506_v33  ;;  %v883_v48 = vadd.f32 %v2387_v13, %v882_v45  ;;  %v1509_v53 = vmul.f32 -1.442695, %v880_v39 }
 0x20c   :  { %v1902_v49 = vpop.eup %1901  ;;  %v1198_v50 = vadd.f32 1.0, %v1900_v46  ;;  %1921 = vpow2.f32 %v1511_v43  ;;  %v1512_v56 = vmul.f32 -1.442695, %v891_v44 }
 0x20d   :  { %v1904_v51 = vpop.eup %1903  ;;  %1923 = vrcp.f32 %v1200_v47  ;;  %v1201_v52 = vadd.f32 1.0, %v1902_v49  ;;  %v1510_v58 = vmul.f32 -1.442695, %v883_v48 }
 0x20e   :  { %v1906_v54 = vpop.eup %1905  ;;  %1925 = vrcp.f32 %v1198_v50  ;;  %v1199_v55 = vadd.f32 1.0, %v1904_v51 }
 0x20f   :  { %v1908_v57 = vpop.eup %1907  ;;  %1388 = vst.msk [vmem:[%s2716_s5 + $0xf0] sm:$0xff] %vm132_vm0, %v1906_v54  ;;  %1927 = vrcp.f32 %v1201_v52  ;;  %v1734_v59 = vpop.f32.mrb[40].mxu1 }
 0x210   :  { %v1910_v60 = vpop.eup %1909  ;;  %1386 = vst.msk [vmem:[%s2716_s5 + $0xe0] sm:$0xff] %vm132_vm0, %v1908_v57  ;;  %1929 = vrcp.f32 %v1199_v55  ;;  %v904_v61 = vadd.f32 %v1734_v59, %v2387_v13  ;;  %v895_v62 = vpop.f32.mrb[41].mxu1 }
 0x211   :  { %v1912_v63 = vpop.eup %1911  ;;  %1389 = vst.msk [vmem:[%s2716_s5 + $0xf8] sm:$0xff] %vm132_vm0, %v1910_v60  ;;  %1931 = vpow2.f32 %v1509_v53  ;;  %v1735_v0 = vpop.f32.mrb[42].mxu1  ;;  %v896_v3 = vadd.f32 %v2387_v13, %v895_v62 }
 0x212   :  { %v1914_v1 = vpop.eup %1913  ;;  %1387 = vst.msk [vmem:[%s2716_s5 + $0xe8] sm:$0xff] %vm132_vm0, %v1912_v63  ;;  %1933 = vpow2.f32 %v1512_v56  ;;  %v1515_v2 = vmul.f32 -1.442695, %v904_v61  ;;  %v898_v4 = vpop.f32.mrb[43].mxu1  ;;  %v907_v7 = vadd.f32 %v1735_v0, %v2387_v13 }
 0x213   :  { %v1916_v5 = vpop.eup %1915  ;;  %v1204_v6 = vadd.f32 1.0, %v1914_v1  ;;  %1935 = vpow2.f32 %v1510_v58  ;;  %v899_v10 = vadd.f32 %v2387_v13, %v898_v4  ;;  %v1513_v16 = vmul.f32 -1.442695, %v896_v3 }
 0x214   :  { %v1918_v8 = vpop.eup %1917  ;;  %v1202_v9 = vadd.f32 1.0, %v1916_v5  ;;  %1937 = vpow2.f32 %v1515_v2  ;;  %v1516_v18 = vmul.f32 -1.442695, %v907_v7 }
 0x215   :  { %v1920_v11 = vpop.eup %1919  ;;  %1939 = vrcp.f32 %v1204_v6  ;;  %v1205_v12 = vadd.f32 1.0, %v1918_v8  ;;  %v1514_v21 = vmul.f32 -1.442695, %v899_v10 }
 0x216   :  { %v1922_v14 = vpop.eup %1921  ;;  %1941 = vrcp.f32 %v1202_v9  ;;  %v1203_v15 = vadd.f32 1.0, %v1920_v11 }
 0x217   :  { %v1924_v17 = vpop.eup %1923  ;;  %1943 = vrcp.f32 %v1205_v12  ;;  %v1208_v41 = vadd.f32 1.0, %v1922_v14  ;;  %v1738_v19 = vpop.f32.mrb[44].mxu1 }
 0x218   :  { %v1926_v20 = vpop.eup %1925  ;;  %1392 = vst.msk [vmem:[%s2716_s5 + $0x110] sm:$0xff] %vm132_vm0, %v1924_v17  ;;  %1945 = vrcp.f32 %v1203_v15  ;;  %v920_v22 = vadd.f32 %v1738_v19, %v2387_v13  ;;  %v911_v23 = vpop.f32.mrb[45].mxu1 }
 0x219   :  { %v1928_v24 = vpop.eup %1927  ;;  %1390 = vst.msk [vmem:[%s2716_s5 + $0x100] sm:$0xff] %vm132_vm0, %v1926_v20  ;;  %1947 = vrcp.f32 %v1208_v41  ;;  %v1739_v25 = vpop.f32.mrb[46].mxu1  ;;  %v912_v28 = vadd.f32 %v2387_v13, %v911_v23 }
 0x21a   :  { %v1930_v26 = vpop.eup %1929  ;;  %1393 = vst.msk [vmem:[%s2716_s5 + $0x118] sm:$0xff] %vm132_vm0, %v1928_v24  ;;  %1949 = vpow2.f32 %v1513_v16  ;;  %v1519_v27 = vmul.f32 -1.442695, %v920_v22  ;;  %v914_v29 = vpop.f32.mrb[47].mxu1  ;;  %v923_v31 = vadd.f32 %v1739_v25, %v2387_v13 }
 0x21b   :  { %v1932_v30 = vpop.eup %1931  ;;  %1391 = vst.msk [vmem:[%s2716_s5 + $0x108] sm:$0xff] %vm132_vm0, %v1930_v26  ;;  %1951 = vpow2.f32 %v1516_v18  ;;  %v915_v34 = vadd.f32 %v2387_v13, %v914_v29  ;;  %v1517_v39 = vmul.f32 -1.442695, %v912_v28 }
 0x21c   :  { %v1934_v32 = vpop.eup %1933  ;;  %v1206_v33 = vadd.f32 1.0, %v1932_v30  ;;  %1953 = vpow2.f32 %v1514_v21  ;;  %v1520_v43 = vmul.f32 -1.442695, %v923_v31 }
 0x21d   :  { %v1936_v35 = vpop.eup %1935  ;;  %v1209_v36 = vadd.f32 1.0, %v1934_v32  ;;  %1955 = vpow2.f32 %v1519_v27  ;;  %v1518_v46 = vmul.f32 -1.442695, %v915_v34 }
 0x21e   :  { %v1938_v37 = vpop.eup %1937  ;;  %1957 = vrcp.f32 %v1206_v33  ;;  %v1207_v38 = vadd.f32 1.0, %v1936_v35 }
 0x21f   :  { %v1940_v40 = vpop.eup %1939  ;;  %1959 = vrcp.f32 %v1209_v36  ;;  %v1212_v42 = vadd.f32 1.0, %v1938_v37  ;;  %v1742_v44 = vpop.f32.mrb[48].mxu1 }
 0x220   :  { %v1942_v45 = vpop.eup %1941  ;;  %1396 = vst.msk [vmem:[%s2716_s5 + $0x130] sm:$0xff] %vm132_vm0, %v1940_v40  ;;  %1961 = vrcp.f32 %v1207_v38  ;;  %v936_v47 = vadd.f32 %v1742_v44, %v2387_v13  ;;  %v927_v48 = vpop.f32.mrb[49].mxu1 }
 0x221   :  { %v1944_v49 = vpop.eup %1943  ;;  %1394 = vst.msk [vmem:[%s2716_s5 + $0x120] sm:$0xff] %vm132_vm0, %v1942_v45  ;;  %1963 = vrcp.f32 %v1212_v42  ;;  %v928_v50 = vadd.f32 %v2387_v13, %v927_v48  ;;  %v1743_v51 = vpop.f32.mrb[50].mxu1 }
 0x222   :  { %v1946_v52 = vpop.eup %1945  ;;  %1397 = vst.msk [vmem:[%s2716_s5 + $0x138] sm:$0xff] %vm132_vm0, %v1944_v49  ;;  %1965 = vpow2.f32 %v1517_v39  ;;  %v1523_v53 = vmul.f32 -1.442695, %v936_v47  ;;  %v930_v54 = vpop.f32.mrb[51].mxu1  ;;  %v939_v57 = vadd.f32 %v1743_v51, %v2387_v13 }
 0x223   :  { %v1948_v55 = vpop.eup %1947  ;;  %1395 = vst.msk [vmem:[%s2716_s5 + $0x128] sm:$0xff] %vm132_vm0, %v1946_v52  ;;  %1967 = vpow2.f32 %v1520_v43  ;;  %v1521_v56 = vmul.f32 -1.442695, %v928_v50  ;;  %v931_v59 = vadd.f32 %v2387_v13, %v930_v54 }
 0x224   :  { %v1950_v58 = vpop.eup %1949  ;;  %1400 = vst.msk [vmem:[%s2716_s5 + $0x150] sm:$0xff] %vm132_vm0, %v1948_v55  ;;  %1969 = vpow2.f32 %v1518_v46  ;;  %v1524_v2 = vmul.f32 -1.442695, %v939_v57  ;;  %v2033_v46 = vld [vmem:[%s2715_s4] ss:$0 sm:$0xff] }
 0x225   :  { %v1952_v60 = vpop.eup %1951  ;;  %v1210_v61 = vadd.f32 1.0, %v1950_v58  ;;  %1971 = vpow2.f32 %v1523_v53  ;;  %v1522_v6 = vmul.f32 -1.442695, %v931_v59 }
 0x226   :  { %v1954_v62 = vpop.eup %1953  ;;  %v1213_v63 = vadd.f32 1.0, %v1952_v60  ;;  %1973 = vpow2.f32 %v1521_v56 }
 0x227   :  { %v1956_v0 = vpop.eup %1955  ;;  %1975 = vrcp.f32 %v1210_v61  ;;  %v1211_v1 = vadd.f32 1.0, %v1954_v62  ;;  %v1746_v3 = vpop.f32.mrb[52].mxu1 }
 0x228   :  { %v1958_v4 = vpop.eup %1957  ;;  %1977 = vrcp.f32 %v1213_v63  ;;  %v1216_v5 = vadd.f32 1.0, %v1956_v0  ;;  %v952_v7 = vadd.f32 %v1746_v3, %v2387_v13  ;;  %v943_v8 = vpop.f32.mrb[53].mxu1 }
 0x229   :  { %v1960_v9 = vpop.eup %1959  ;;  %1398 = vst.msk [vmem:[%s2716_s5 + $0x140] sm:$0xff] %vm132_vm0, %v1958_v4  ;;  %1979 = vrcp.f32 %v1211_v1  ;;  %v944_v10 = vadd.f32 %v2387_v13, %v943_v8  ;;  %v1747_v11 = vpop.f32.mrb[54].mxu1 }
 0x22a   :  { %v1962_v12 = vpop.eup %1961  ;;  %1401 = vst.msk [vmem:[%s2716_s5 + $0x158] sm:$0xff] %vm132_vm0, %v1960_v9  ;;  %1981 = vrcp.f32 %v1216_v5  ;;  %v1527_v14 = vmul.f32 -1.442695, %v952_v7  ;;  %v946_v15 = vpop.f32.mrb[55].mxu1  ;;  %v955_v18 = vadd.f32 %v1747_v11, %v2387_v13 }
 0x22b   :  { %v1964_v16 = vpop.eup %1963  ;;  %1399 = vst.msk [vmem:[%s2716_s5 + $0x148] sm:$0xff] %vm132_vm0, %v1962_v12  ;;  %1983 = vpow2.f32 %v1524_v2  ;;  %v1525_v17 = vmul.f32 -1.442695, %v944_v10  ;;  %v947_v21 = vadd.f32 %v2387_v13, %v946_v15 }
 0x22c   :  { %v1966_v41 = vpop.eup %1965  ;;  %1404 = vst.msk [vmem:[%s2716_s5 + $0x170] sm:$0xff] %vm132_vm0, %v1964_v16  ;;  %1985 = vpow2.f32 %v1522_v6  ;;  %v1528_v29 = vmul.f32 -1.442695, %v955_v18 }
 0x22d   :  { %v1968_v19 = vpop.eup %1967  ;;  %v1214_v20 = vadd.f32 1.0, %v1966_v41  ;;  %1987 = vpow2.f32 %v1527_v14  ;;  %v1526_v34 = vmul.f32 -1.442695, %v947_v21 }
 0x22e   :  { %v1970_v22 = vpop.eup %1969  ;;  %v1217_v23 = vadd.f32 1.0, %v1968_v19  ;;  %1989 = vpow2.f32 %v1525_v17 }
 0x22f   :  { %v1972_v24 = vpop.eup %1971  ;;  %1991 = vrcp.f32 %v1214_v20  ;;  %v1215_v25 = vadd.f32 1.0, %v1970_v22  ;;  %v1750_v26 = vpop.f32.mrb[56].mxu1 }
 0x230   :  { %v1974_v27 = vpop.eup %1973  ;;  %1993 = vrcp.f32 %v1217_v23  ;;  %v1220_v28 = vadd.f32 1.0, %v1972_v24  ;;  %v968_v30 = vadd.f32 %v1750_v26, %v2387_v13  ;;  %v959_v31 = vpop.f32.mrb[57].mxu1 }
 0x231   :  { %v1976_v32 = vpop.eup %1975  ;;  %1995 = vrcp.f32 %v1215_v25  ;;  %v1218_v33 = vadd.f32 1.0, %v1974_v27  ;;  %v960_v35 = vadd.f32 %v2387_v13, %v959_v31  ;;  %v1751_v36 = vpop.f32.mrb[58].mxu1 }
 0x232   :  { %v1978_v37 = vpop.eup %1977  ;;  %1402 = vst.msk [vmem:[%s2716_s5 + $0x160] sm:$0xff] %vm132_vm0, %v1976_v32  ;;  %1997 = vrcp.f32 %v1220_v28  ;;  %v1531_v38 = vmul.f32 -1.442695, %v968_v30  ;;  %v962_v39 = vpop.f32.mrb[59].mxu1  ;;  %v971_v44 = vadd.f32 %v1751_v36, %v2387_v13 }
 0x233   :  { %v1980_v40 = vpop.eup %1979  ;;  %1405 = vst.msk [vmem:[%s2716_s5 + $0x178] sm:$0xff] %vm132_vm0, %v1978_v37  ;;  %1999 = vrcp.f32 %v1218_v33  ;;  %v1529_v42 = vmul.f32 -1.442695, %v960_v35  ;;  %v963_v47 = vadd.f32 %v2033_v46, %v962_v39 }
 0x234   :  { %v1982_v43 = vpop.eup %1981  ;;  %1403 = vst.msk [vmem:[%s2716_s5 + $0x168] sm:$0xff] %vm132_vm0, %v1980_v40  ;;  %2001 = vpow2.f32 %v1528_v29  ;;  %v1532_v53 = vmul.f32 -1.442695, %v971_v44 }
 0x235   :  { %v1984_v45 = vpop.eup %1983  ;;  %1408 = vst.msk [vmem:[%s2716_s5 + $0x190] sm:$0xff] %vm132_vm0, %v1982_v43  ;;  %2003 = vpow2.f32 %v1526_v34  ;;  %v1530_v56 = vmul.f32 -1.442695, %v963_v47 }
 0x236   :  { %v1986_v48 = vpop.eup %1985  ;;  %v1221_v49 = vadd.f32 1.0, %v1984_v45  ;;  %2005 = vpow2.f32 %v1531_v38 }
 0x237   :  { %v1988_v50 = vpop.eup %1987  ;;  %v1219_v51 = vadd.f32 1.0, %v1986_v48  ;;  %2007 = vpow2.f32 %v1529_v42 }
 0x238   :  { %v1990_v52 = vpop.eup %1989  ;;  %2009 = vrcp.f32 %v1221_v49  ;;  %v1224_v13 = vadd.f32 1.0, %v1988_v50 }
 0x239   :  { %v1992_v54 = vpop.eup %1991  ;;  %2011 = vrcp.f32 %v1219_v51  ;;  %v1222_v55 = vadd.f32 1.0, %v1990_v52 }
 0x23a   :  { %v1994_v57 = vpop.eup %1993  ;;  %1406 = vst.msk [vmem:[%s2716_s5 + $0x180] sm:$0xff] %vm132_vm0, %v1992_v54  ;;  %2013 = vrcp.f32 %v1224_v13 }
 0x23b   :  { %v1996_v58 = vpop.eup %1995  ;;  %1409 = vst.msk [vmem:[%s2716_s5 + $0x198] sm:$0xff] %vm132_vm0, %v1994_v57  ;;  %2015 = vrcp.f32 %v1222_v55 }
 0x23c   :  { %v1998_v59 = vpop.eup %1997  ;;  %1407 = vst.msk [vmem:[%s2716_s5 + $0x188] sm:$0xff] %vm132_vm0, %v1996_v58  ;;  %2017 = vpow2.f32 %v1532_v53 }
 0x23d   :  { %v2000_v60 = vpop.eup %1999  ;;  %1412 = vst.msk [vmem:[%s2716_s5 + $0x1b0] sm:$0xff] %vm132_vm0, %v1998_v59  ;;  %2019 = vpow2.f32 %v1530_v56 }
 0x23e   :  { %v2002_v61 = vpop.eup %2001  ;;  %1410 = vst.msk [vmem:[%s2716_s5 + $0x1a0] sm:$0xff] %vm132_vm0, %v2000_v60 }
 0x23f   :  { %v2004_v62 = vpop.eup %2003  ;;  %v1225_v63 = vadd.f32 1.0, %v2002_v61 }
 0x240   :  { %v2006_v0 = vpop.eup %2005  ;;  %v1223_v1 = vadd.f32 1.0, %v2004_v62 }
 0x241   :  { %v2008_v2 = vpop.eup %2007  ;;  %2021 = vrcp.f32 %v1225_v63  ;;  %v1228_v3 = vadd.f32 1.0, %v2006_v0 }
 0x242   :  { %v2010_v4 = vpop.eup %2009  ;;  %2023 = vrcp.f32 %v1223_v1  ;;  %v1226_v5 = vadd.f32 1.0, %v2008_v2 }
 0x243   :  { %v2012_v6 = vpop.eup %2011  ;;  %1413 = vst.msk [vmem:[%s2716_s5 + $0x1b8] sm:$0xff] %vm132_vm0, %v2010_v4  ;;  %2025 = vrcp.f32 %v1228_v3 }
 0x244   :  { %v2014_v7 = vpop.eup %2013  ;;  %1411 = vst.msk [vmem:[%s2716_s5 + $0x1a8] sm:$0xff] %vm132_vm0, %v2012_v6  ;;  %2027 = vrcp.f32 %v1226_v5 }
 0x245   :  { %v2016_v8 = vpop.eup %2015  ;;  %1416 = vst.msk [vmem:[%s2716_s5 + $0x1d0] sm:$0xff] %vm132_vm0, %v2014_v7 }
 0x246   :  { %v2018_v9 = vpop.eup %2017  ;;  %1414 = vst.msk [vmem:[%s2716_s5 + $0x1c0] sm:$0xff] %vm132_vm0, %v2016_v8 }
 0x247   :  { %v2020_v10 = vpop.eup %2019  ;;  %v1229_v11 = vadd.f32 1.0, %v2018_v9 }
 0x248   :  { %v1227_v12 = vadd.f32 1.0, %v2020_v10 }
 0x249   :  { %2029 = vrcp.f32 %v1229_v11 }
 0x24a   :  { %2031 = vrcp.f32 %v1227_v12 }
 0x24b   :  { %v2022_v14 = vpop.eup %2021 }
 0x24c   :  { %v2024_v15 = vpop.eup %2023  ;;  %1417 = vst.msk [vmem:[%s2716_s5 + $0x1d8] sm:$0xff] %vm132_vm0, %v2022_v14 }
 0x24d   :  { %v2026_v16 = vpop.eup %2025  ;;  %1415 = vst.msk [vmem:[%s2716_s5 + $0x1c8] sm:$0xff] %vm132_vm0, %v2024_v15 }
 0x24e   :  { %v2028_v17 = vpop.eup %2027  ;;  %1420 = vst.msk [vmem:[%s2716_s5 + $0x1f0] sm:$0xff] %vm132_vm0, %v2026_v16 }
 0x24f   :  { %1418 = vst.msk [vmem:[%s2716_s5 + $0x1e0] sm:$0xff] %vm132_vm0, %v2028_v17 }
 0x253   :  { %v2030_v41 = vpop.eup %2029 }
 0x254   :  { %v2032_v18 = vpop.eup %2031  ;;  %1421 = vst.msk [vmem:[%s2716_s5 + $0x1f8] sm:$0xff] %vm132_vm0, %v2030_v41 }
 0x255   :  { %1419 = vst.msk [vmem:[%s2716_s5 + $0x1e8] sm:$0xff] %vm132_vm0, %v2032_v18 }

</bundles_post_ra>
